<compile_context>
chip_gen: v6e
topology: v6e:2x2x1
jax: 0.10.0
libtpu: 0.0.40
codegen_flags: <defaults>
</compile_context>

<pallas_src>
import functools

import jax
import jax.numpy as jnp
from jax.experimental import pallas as pl
from jax.experimental.pallas import tpu as pltpu


def _round_up(v, m):
    return (v + m - 1) // m * m


# --------------------------- fused SkipLSTM kernel ---------------------------
def _skip_lstm_kernel(x_ref, wih_ref, whh_ref, bias_ref, wint_ref, out_ref,
                      xp_scr, h_scr, c_scr, hs_scr,
                      *, n_steps, bp, hp, batch):
    H = hp

    # (1) Hoisted input projection: all timesteps in one big MXU matmul.
    #     x_ref: (Ls*Bp, I) @ wih_ref: (I, 4*Hp)  ->  xp_scr: (Ls*Bp, 4*Hp)
    xp_scr[...] = (
        jnp.dot(x_ref[...], wih_ref[...], preferred_element_type=jnp.float32)
        + bias_ref[...])

    # (2) Recurrence: single in-kernel loop, states resident in VMEM.
    h_scr[...] = jnp.zeros_like(h_scr)
    c_scr[...] = jnp.zeros_like(c_scr)
    whh = whh_ref[...]                         # (Hp, 4*Hp), loaded once

    def step(t, carry):
        row = pl.multiple_of(t * bp, bp)
        x_t = xp_scr[pl.ds(row, bp), :]        # (Bp, 4*Hp) precomputed projection
        gates = x_t + jnp.dot(h_scr[...], whh,
                              preferred_element_type=jnp.float32)
        # Gate slabs are Hp-wide (multiple of 128) -> lane-aligned sub-views.
        i = jax.nn.sigmoid(gates[:, 0 * H:1 * H])
        f = jax.nn.sigmoid(gates[:, 1 * H:2 * H])
        g = jnp.tanh(gates[:, 2 * H:3 * H])
        o = jax.nn.sigmoid(gates[:, 3 * H:4 * H])
        c_new = f * c_scr[...] + i * g
        h_new = o * jnp.tanh(c_new)
        c_scr[...] = c_new
        h_scr[...] = h_new
        hs_scr[t] = h_new                      # (Bp, Hp) time-major history
        return carry

    jax.lax.fori_loop(0, n_steps, step, 0, unroll=(n_steps <= 32))

    # (3) Fused interpolation epilogue: out[b] = W_interp @ hs[:, b, :]
    #     (L, Ls) @ (Ls, Hp) per real batch row; lane-dense (Hp % 128 == 0).
    w_int = wint_ref[...]
    for b in range(batch):                     # static: real batch rows only
        out_ref[b] = jnp.dot(w_int, hs_scr[:, b, :],
                             preferred_element_type=jnp.float32)


def _run_skip_lstm(x2d, wih_p, whh_p, bias_p, w_int,
                   *, n_steps, bp, hp, batch, seq_len):
    Ls = n_steps
    I = x2d.shape[1]
    kern = functools.partial(_skip_lstm_kernel,
                             n_steps=Ls, bp=bp, hp=hp, batch=batch)
    return pl.pallas_call(
        kern,
        out_shape=jax.ShapeDtypeStruct((batch, seq_len, hp), jnp.float32),
        grid=(1,),
        in_specs=[
            pl.BlockSpec((Ls * bp, I), lambda i: (0, 0)),      # skipped x (time-major)
            pl.BlockSpec((I, 4 * hp), lambda i: (0, 0)),       # W_ih^T (gate-padded)
            pl.BlockSpec((hp, 4 * hp), lambda i: (0, 0)),      # W_hh^T (gate-padded)
            pl.BlockSpec((1, 4 * hp), lambda i: (0, 0)),       # b_ih + b_hh
            pl.BlockSpec((seq_len, Ls), lambda i: (0, 0)),     # interpolation matrix
        ],
        out_specs=pl.BlockSpec((batch, seq_len, hp), lambda i: (0, 0, 0)),
        scratch_shapes=[
            pltpu.VMEM((Ls * bp, 4 * hp), jnp.float32),  # hoisted x-projection
            pltpu.VMEM((bp, hp), jnp.float32),           # h state
            pltpu.VMEM((bp, hp), jnp.float32),           # c state
            pltpu.VMEM((Ls, bp, hp), jnp.float32),       # hidden-state history
        ],
        compiler_params=pltpu.CompilerParams(
            dimension_semantics=("arbitrary",)),
    )(x2d, wih_p, whh_p, bias_p, w_int)


# ------------------------------ glue / setup --------------------------------
def make_interp_matrix(l_out, l_in):
    """F.interpolate(..., mode='linear', align_corners=True) as (l_out, l_in)."""
    if l_in == 1:
        return jnp.ones((l_out, 1), dtype=jnp.float32)
    if l_out == 1:
        return jnp.zeros((1, l_in), dtype=jnp.float32).at[0, 0].set(1.0)
    pos = jnp.arange(l_out, dtype=jnp.float32) * (l_in - 1) / (l_out - 1)
    lo = jnp.clip(jnp.floor(pos).astype(jnp.int32), 0, l_in - 2)
    w = pos - lo.astype(jnp.float32)
    return (jax.nn.one_hot(lo, l_in, dtype=jnp.float32) * (1.0 - w)[:, None]
            + jax.nn.one_hot(lo + 1, l_in, dtype=jnp.float32) * w[:, None])


def _pad_gate_cols(w_t, h, hp):
    """(rows, 4h) with i/f/g/o column blocks -> (rows, 4hp), each gate lane-aligned."""
    rows = w_t.shape[0]
    out = jnp.zeros((rows, 4 * hp), w_t.dtype)
    for g in range(4):
        out = out.at[:, g * hp:g * hp + h].set(w_t[:, g * h:(g + 1) * h])
    return out


def init_params(key, input_size, hidden_size):
    """Deterministic init matching nn.LSTM shapes (uniform +/- 1/sqrt(H))."""
    stdv = 1.0 / jnp.sqrt(jnp.float32(hidden_size))
    k1, k2, k3, k4 = jax.random.split(key, 4)
    return {
        "w_ih": jax.random.uniform(k1, (4 * hidden_size, input_size), jnp.float32, -stdv, stdv),
        "w_hh": jax.random.uniform(k2, (4 * hidden_size, hidden_size), jnp.float32, -stdv, stdv),
        "b_ih": jax.random.uniform(k3, (4 * hidden_size,), jnp.float32, -stdv, stdv),
        "b_hh": jax.random.uniform(k4, (4 * hidden_size,), jnp.float32, -stdv, stdv),
    }


@functools.partial(jax.jit, static_argnames=("k",))
def skip_lstm_forward(x, params, *, k):
    """x: (B, L, input_size) -> (B, L, hidden_size)."""
    B, L, I = x.shape
    H = params["w_hh"].shape[1]
    Hp = _round_up(H, 128)    # lane-align each gate slab
    Bp = _round_up(B, 8)      # sublane-align the batch

    skip_x = x[:, ::k, :]                                   # (B, Ls, I)
    Ls = skip_x.shape[1]

    # Gate-padded weights (PyTorch gate order i, f, g, o).
    wih_p = _pad_gate_cols(params["w_ih"].T, H, Hp)                 # (I, 4Hp)
    whh_p = _pad_gate_cols(params["w_hh"].T, H, Hp)                 # (H, 4Hp)
    whh_p = jnp.pad(whh_p, ((0, Hp - H), (0, 0)))                   # (Hp, 4Hp)
    bias_p = _pad_gate_cols((params["b_ih"] + params["b_hh"])[None, :], H, Hp)  # (1, 4Hp)

    # Fold skip stride + time-major layout + batch pad into one tiny XLA copy.
    skip_tm = jnp.transpose(skip_x, (1, 0, 2))                      # (Ls, B, I)
    skip_tm = jnp.pad(skip_tm, ((0, 0), (0, Bp - B), (0, 0)))       # (Ls, Bp, I)
    x2d = skip_tm.reshape(Ls * Bp, I)

    w_int = make_interp_matrix(L, Ls)                               # (L, Ls)

    out_p = _run_skip_lstm(x2d, wih_p, whh_p, bias_p, w_int,
                           n_steps=Ls, bp=Bp, hp=Hp, batch=B, seq_len=L)
    return out_p[:, :, :H]                                          # (B, L, H)


# ------------------------------ reference ----------------------------------
def skip_lstm_reference(x, params, k):
    skip_x = x[:, ::k, :]
    H = params["w_hh"].shape[1]
    B = x.shape[0]
    wih_t, whh_t = params["w_ih"].T, params["w_hh"].T
    b = params["b_ih"] + params["b_hh"]

    def step(carry, x_t):
        h, c = carry
        gates = x_t @ wih_t + h @ whh_t + b
        i = jax.nn.sigmoid(gates[:, 0:H])
        f = jax.nn.sigmoid(gates[:, H:2 * H])
        g = jnp.tanh(gates[:, 2 * H:3 * H])
        o = jax.nn.sigmoid(gates[:, 3 * H:4 * H])
        c = f * c + i * g
        h = o * jnp.tanh(c)
        return (h, c), h

    h0 = jnp.zeros((B, H), jnp.float32)
    _, hs = jax.lax.scan(step, (h0, h0), jnp.transpose(skip_x, (1, 0, 2)))
    out = jnp.transpose(hs, (1, 0, 2))                  # (B, Ls, H)
    w_interp = make_interp_matrix(x.shape[1], out.shape[1])
    return jnp.einsum("ls,bsh->blh", w_interp, out)


# --------------------------------- main -------------------------------------
if __name__ == "__main__":
    B, L, INPUT_SIZE, HIDDEN_SIZE, K = 2, 16, 8, 32, 2

    key = jax.random.PRNGKey(0)
    k_x, k_p = jax.random.split(key)
    x = jax.random.normal(k_x, (B, L, INPUT_SIZE), dtype=jnp.float32)
    params = init_params(k_p, INPUT_SIZE, HIDDEN_SIZE)

    out = jax.block_until_ready(skip_lstm_forward(x, params, k=K))
    ref = jax.block_until_ready(skip_lstm_reference(x, params, K))

    assert out.shape == (B, L, HIDDEN_SIZE), out.shape
    assert jnp.allclose(out, ref, rtol=1e-3, atol=1e-3), float(jnp.max(jnp.abs(out - ref)))

    print("KERNEL_OK")
</pallas_src>

<mosaic_0001>
module attributes {stable_mosaic.version = 11 : i64} {
  func.func @_skip_lstm_kernel(%arg0: i32, %arg1: memref<64x8xf32, #tpu.memory_space<vmem>>, %arg2: memref<8x512xf32, #tpu.memory_space<vmem>>, %arg3: memref<128x512xf32, #tpu.memory_space<vmem>>, %arg4: memref<1x512xf32, #tpu.memory_space<vmem>>, %arg5: memref<16x8xf32, #tpu.memory_space<vmem>>, %arg6: memref<2x16x128xf32, #tpu.memory_space<vmem>>, %arg7: memref<64x512xf32, #tpu.memory_space<vmem>>, %arg8: memref<8x128xf32, #tpu.memory_space<vmem>>, %arg9: memref<8x128xf32, #tpu.memory_space<vmem>>, %arg10: memref<8x8x128xf32, #tpu.memory_space<vmem>>) attributes {dimension_semantics = [#tpu.dimension_semantics<arbitrary>], iteration_bounds = array<i64: 1>, scalar_prefetch = 0 : i64, scratch_operands = 4 : i64, tpu.core_type = #tpu.core_type<tc>, window_params = [{pipeline_mode = #tpu.pipeline_mode<synchronous>, transform_indices = @transform_0, window_bounds = array<i64: 64, 8>}, {pipeline_mode = #tpu.pipeline_mode<synchronous>, transform_indices = @transform_1, window_bounds = array<i64: 8, 512>}, {pipeline_mode = #tpu.pipeline_mode<synchronous>, transform_indices = @transform_2, window_bounds = array<i64: 128, 512>}, {pipeline_mode = #tpu.pipeline_mode<synchronous>, transform_indices = @transform_3, window_bounds = array<i64: 1, 512>}, {pipeline_mode = #tpu.pipeline_mode<synchronous>, transform_indices = @transform_4, window_bounds = array<i64: 16, 8>}, {pipeline_mode = #tpu.pipeline_mode<synchronous>, transform_indices = @transform_5, window_bounds = array<i64: 2, 16, 128>}]} {
    %c0 = arith.constant 0 : index
    %c0_0 = arith.constant 0 : index
    %0 = vector.load %arg1[%c0, %c0_0] : memref<64x8xf32, #tpu.memory_space<vmem>>, vector<64x8xf32>
    %c0_1 = arith.constant 0 : index
    %c0_2 = arith.constant 0 : index
    %1 = vector.load %arg2[%c0_1, %c0_2] : memref<8x512xf32, #tpu.memory_space<vmem>>, vector<8x512xf32>
    %cst = arith.constant dense<0.000000e+00> : vector<64x512xf32>
    %2 = tpu.matmul %0, %1, %cst {dimension_numbers = #tpu.dot_dimension_numbers<[1], [0], [0], [1], [0, 0, 1, 1], [], []>} : vector<64x8xf32>, vector<8x512xf32>, vector<64x512xf32> -> vector<64x512xf32>
    %c0_3 = arith.constant 0 : index
    %c0_4 = arith.constant 0 : index
    %3 = vector.load %arg4[%c0_3, %c0_4] : memref<1x512xf32, #tpu.memory_space<vmem>>, vector<1x512xf32>
    %4 = vector.broadcast %3 : vector<1x512xf32> to vector<64x512xf32>
    %5 = arith.addf %2, %4 : vector<64x512xf32>
    %c0_5 = arith.constant 0 : index
    %c0_6 = arith.constant 0 : index
    %6 = vector.load %arg7[%c0_5, %c0_6] : memref<64x512xf32, #tpu.memory_space<vmem>>, vector<64x512xf32>
    tpu.vector_store %arg7[%c0_5, %c0_6], %5 {strides = array<i32>} : memref<64x512xf32, #tpu.memory_space<vmem>>, vector<64x512xf32>,
    %cst_7 = arith.constant 0.000000e+00 : f32
    %7 = vector.broadcast %cst_7 : f32 to vector<8x128xf32>
    %c0_8 = arith.constant 0 : index
    %c0_9 = arith.constant 0 : index
    %8 = vector.load %arg8[%c0_8, %c0_9] : memref<8x128xf32, #tpu.memory_space<vmem>>, vector<8x128xf32>
    tpu.vector_store %arg8[%c0_8, %c0_9], %7 {strides = array<i32>} : memref<8x128xf32, #tpu.memory_space<vmem>>, vector<8x128xf32>,
    %cst_10 = arith.constant 0.000000e+00 : f32
    %9 = vector.broadcast %cst_10 : f32 to vector<8x128xf32>
    %c0_11 = arith.constant 0 : index
    %c0_12 = arith.constant 0 : index
    %10 = vector.load %arg9[%c0_11, %c0_12] : memref<8x128xf32, #tpu.memory_space<vmem>>, vector<8x128xf32>
    tpu.vector_store %arg9[%c0_11, %c0_12], %9 {strides = array<i32>} : memref<8x128xf32, #tpu.memory_space<vmem>>, vector<8x128xf32>,
    %c0_13 = arith.constant 0 : index
    %c0_14 = arith.constant 0 : index
    %11 = vector.load %arg3[%c0_13, %c0_14] : memref<128x512xf32, #tpu.memory_space<vmem>>, vector<128x512xf32>
    %c0_i32 = arith.constant 0 : i32
    %c8_i32 = arith.constant 8 : i32
    %12 = arith.muli %c0_i32, %c8_i32 : i32
    %13 = tpu.assume_multiple %12, 8 : i32
    %14 = arith.index_cast %13 : i32 to index
    %c0_15 = arith.constant 0 : index
    %15 = vector.load %arg7[%14, %c0_15] : memref<64x512xf32, #tpu.memory_space<vmem>>, vector<8x512xf32>
    %c0_16 = arith.constant 0 : index
    %c0_17 = arith.constant 0 : index
    %16 = vector.load %arg8[%c0_16, %c0_17] : memref<8x128xf32, #tpu.memory_space<vmem>>, vector<8x128xf32>
    %cst_18 = arith.constant dense<0.000000e+00> : vector<8x512xf32>
    %17 = tpu.matmul %16, %11, %cst_18 {dimension_numbers = #tpu.dot_dimension_numbers<[1], [0], [0], [1], [0, 0, 1, 1], [], []>} : vector<8x128xf32>, vector<128x512xf32>, vector<8x512xf32> -> vector<8x512xf32>
    %18 = arith.addf %15, %17 : vector<8x512xf32>
    %19 = vector.extract_strided_slice %18 {offsets = [0, 0], sizes = [8, 128], strides = [1, 1]} : vector<8x512xf32> to vector<8x128xf32>
    %20 = arith.negf %19 : vector<8x128xf32>
    %21 = math.exp %20 : vector<8x128xf32>
    %cst_19 = arith.constant 1.000000e+00 : f32
    %22 = vector.broadcast %cst_19 : f32 to vector<8x128xf32>
    %23 = arith.addf %22, %21 : vector<8x128xf32>
    %24 = arith.divf %22, %23 : vector<8x128xf32>
    %25 = vector.extract_strided_slice %18 {offsets = [0, 128], sizes = [8, 128], strides = [1, 1]} : vector<8x512xf32> to vector<8x128xf32>
    %26 = arith.negf %25 : vector<8x128xf32>
    %27 = math.exp %26 : vector<8x128xf32>
    %cst_20 = arith.constant 1.000000e+00 : f32
    %28 = vector.broadcast %cst_20 : f32 to vector<8x128xf32>
    %29 = arith.addf %28, %27 : vector<8x128xf32>
    %30 = arith.divf %28, %29 : vector<8x128xf32>
    %31 = vector.extract_strided_slice %18 {offsets = [0, 256], sizes = [8, 128], strides = [1, 1]} : vector<8x512xf32> to vector<8x128xf32>
    %32 = math.tanh %31 : vector<8x128xf32>
    %33 = vector.extract_strided_slice %18 {offsets = [0, 384], sizes = [8, 128], strides = [1, 1]} : vector<8x512xf32> to vector<8x128xf32>
    %34 = arith.negf %33 : vector<8x128xf32>
    %35 = math.exp %34 : vector<8x128xf32>
    %cst_21 = arith.constant 1.000000e+00 : f32
    %36 = vector.broadcast %cst_21 : f32 to vector<8x128xf32>
    %37 = arith.addf %36, %35 : vector<8x128xf32>
    %38 = arith.divf %36, %37 : vector<8x128xf32>
    %c0_22 = arith.constant 0 : index
    %c0_23 = arith.constant 0 : index
    %39 = vector.load %arg9[%c0_22, %c0_23] : memref<8x128xf32, #tpu.memory_space<vmem>>, vector<8x128xf32>
    %40 = arith.mulf %30, %39 : vector<8x128xf32>
    %41 = arith.mulf %24, %32 : vector<8x128xf32>
    %42 = arith.addf %40, %41 : vector<8x128xf32>
    %43 = math.tanh %42 : vector<8x128xf32>
    %44 = arith.mulf %38, %43 : vector<8x128xf32>
    %c0_24 = arith.constant 0 : index
    %c0_25 = arith.constant 0 : index
    %45 = vector.load %arg9[%c0_24, %c0_25] : memref<8x128xf32, #tpu.memory_space<vmem>>, vector<8x128xf32>
    tpu.vector_store %arg9[%c0_24, %c0_25], %42 {strides = array<i32>} : memref<8x128xf32, #tpu.memory_space<vmem>>, vector<8x128xf32>,
    %c0_26 = arith.constant 0 : index
    %c0_27 = arith.constant 0 : index
    %46 = vector.load %arg8[%c0_26, %c0_27] : memref<8x128xf32, #tpu.memory_space<vmem>>, vector<8x128xf32>
    tpu.vector_store %arg8[%c0_26, %c0_27], %44 {strides = array<i32>} : memref<8x128xf32, #tpu.memory_space<vmem>>, vector<8x128xf32>,
    %47 = arith.index_cast %c0_i32 : i32 to index
    %c0_28 = arith.constant 0 : index
    %c0_29 = arith.constant 0 : index
    %48 = vector.load %arg10[%47, %c0_28, %c0_29] : memref<8x8x128xf32, #tpu.memory_space<vmem>>, vector<1x8x128xf32>
    %49 = vector.shape_cast %48 : vector<1x8x128xf32> to vector<8x128xf32>
    %50 = vector.shape_cast %44 : vector<8x128xf32> to vector<1x8x128xf32>
    tpu.vector_store %arg10[%47, %c0_28, %c0_29], %50 {strides = array<i32>} : memref<8x8x128xf32, #tpu.memory_space<vmem>>, vector<1x8x128xf32>,
    %c1_i32 = arith.constant 1 : i32
    %c8_i32_30 = arith.constant 8 : i32
    %51 = arith.muli %c1_i32, %c8_i32_30 : i32
    %52 = tpu.assume_multiple %51, 8 : i32
    %53 = arith.index_cast %52 : i32 to index
    %c0_31 = arith.constant 0 : index
    %54 = vector.load %arg7[%53, %c0_31] : memref<64x512xf32, #tpu.memory_space<vmem>>, vector<8x512xf32>
    %c0_32 = arith.constant 0 : index
    %c0_33 = arith.constant 0 : index
    %55 = vector.load %arg8[%c0_32, %c0_33] : memref<8x128xf32, #tpu.memory_space<vmem>>, vector<8x128xf32>
    %cst_34 = arith.constant dense<0.000000e+00> : vector<8x512xf32>
    %56 = tpu.matmul %55, %11, %cst_34 {dimension_numbers = #tpu.dot_dimension_numbers<[1], [0], [0], [1], [0, 0, 1, 1], [], []>} : vector<8x128xf32>, vector<128x512xf32>, vector<8x512xf32> -> vector<8x512xf32>
    %57 = arith.addf %54, %56 : vector<8x512xf32>
    %58 = vector.extract_strided_slice %57 {offsets = [0, 0], sizes = [8, 128], strides = [1, 1]} : vector<8x512xf32> to vector<8x128xf32>
    %59 = arith.negf %58 : vector<8x128xf32>
    %60 = math.exp %59 : vector<8x128xf32>
    %cst_35 = arith.constant 1.000000e+00 : f32
    %61 = vector.broadcast %cst_35 : f32 to vector<8x128xf32>
    %62 = arith.addf %61, %60 : vector<8x128xf32>
    %63 = arith.divf %61, %62 : vector<8x128xf32>
    %64 = vector.extract_strided_slice %57 {offsets = [0, 128], sizes = [8, 128], strides = [1, 1]} : vector<8x512xf32> to vector<8x128xf32>
    %65 = arith.negf %64 : vector<8x128xf32>
    %66 = math.exp %65 : vector<8x128xf32>
    %cst_36 = arith.constant 1.000000e+00 : f32
    %67 = vector.broadcast %cst_36 : f32 to vector<8x128xf32>
    %68 = arith.addf %67, %66 : vector<8x128xf32>
    %69 = arith.divf %67, %68 : vector<8x128xf32>
    %70 = vector.extract_strided_slice %57 {offsets = [0, 256], sizes = [8, 128], strides = [1, 1]} : vector<8x512xf32> to vector<8x128xf32>
    %71 = math.tanh %70 : vector<8x128xf32>
    %72 = vector.extract_strided_slice %57 {offsets = [0, 384], sizes = [8, 128], strides = [1, 1]} : vector<8x512xf32> to vector<8x128xf32>
    %73 = arith.negf %72 : vector<8x128xf32>
    %74 = math.exp %73 : vector<8x128xf32>
    %cst_37 = arith.constant 1.000000e+00 : f32
    %75 = vector.broadcast %cst_37 : f32 to vector<8x128xf32>
    %76 = arith.addf %75, %74 : vector<8x128xf32>
    %77 = arith.divf %75, %76 : vector<8x128xf32>
    %c0_38 = arith.constant 0 : index
    %c0_39 = arith.constant 0 : index
    %78 = vector.load %arg9[%c0_38, %c0_39] : memref<8x128xf32, #tpu.memory_space<vmem>>, vector<8x128xf32>
    %79 = arith.mulf %69, %78 : vector<8x128xf32>
    %80 = arith.mulf %63, %71 : vector<8x128xf32>
    %81 = arith.addf %79, %80 : vector<8x128xf32>
    %82 = math.tanh %81 : vector<8x128xf32>
    %83 = arith.mulf %77, %82 : vector<8x128xf32>
    %c0_40 = arith.constant 0 : index
    %c0_41 = arith.constant 0 : index
    %84 = vector.load %arg9[%c0_40, %c0_41] : memref<8x128xf32, #tpu.memory_space<vmem>>, vector<8x128xf32>
    tpu.vector_store %arg9[%c0_40, %c0_41], %81 {strides = array<i32>} : memref<8x128xf32, #tpu.memory_space<vmem>>, vector<8x128xf32>,
    %c0_42 = arith.constant 0 : index
    %c0_43 = arith.constant 0 : index
    %85 = vector.load %arg8[%c0_42, %c0_43] : memref<8x128xf32, #tpu.memory_space<vmem>>, vector<8x128xf32>
    tpu.vector_store %arg8[%c0_42, %c0_43], %83 {strides = array<i32>} : memref<8x128xf32, #tpu.memory_space<vmem>>, vector<8x128xf32>,
    %86 = arith.index_cast %c1_i32 : i32 to index
    %c0_44 = arith.constant 0 : index
    %c0_45 = arith.constant 0 : index
    %87 = vector.load %arg10[%86, %c0_44, %c0_45] : memref<8x8x128xf32, #tpu.memory_space<vmem>>, vector<1x8x128xf32>
    %88 = vector.shape_cast %87 : vector<1x8x128xf32> to vector<8x128xf32>
    %89 = vector.shape_cast %83 : vector<8x128xf32> to vector<1x8x128xf32>
    tpu.vector_store %arg10[%86, %c0_44, %c0_45], %89 {strides = array<i32>} : memref<8x8x128xf32, #tpu.memory_space<vmem>>, vector<1x8x128xf32>,
    %c2_i32 = arith.constant 2 : i32
    %c8_i32_46 = arith.constant 8 : i32
    %90 = arith.muli %c2_i32, %c8_i32_46 : i32
    %91 = tpu.assume_multiple %90, 8 : i32
    %92 = arith.index_cast %91 : i32 to index
    %c0_47 = arith.constant 0 : index
    %93 = vector.load %arg7[%92, %c0_47] : memref<64x512xf32, #tpu.memory_space<vmem>>, vector<8x512xf32>
    %c0_48 = arith.constant 0 : index
    %c0_49 = arith.constant 0 : index
    %94 = vector.load %arg8[%c0_48, %c0_49] : memref<8x128xf32, #tpu.memory_space<vmem>>, vector<8x128xf32>
    %cst_50 = arith.constant dense<0.000000e+00> : vector<8x512xf32>
    %95 = tpu.matmul %94, %11, %cst_50 {dimension_numbers = #tpu.dot_dimension_numbers<[1], [0], [0], [1], [0, 0, 1, 1], [], []>} : vector<8x128xf32>, vector<128x512xf32>, vector<8x512xf32> -> vector<8x512xf32>
    %96 = arith.addf %93, %95 : vector<8x512xf32>
    %97 = vector.extract_strided_slice %96 {offsets = [0, 0], sizes = [8, 128], strides = [1, 1]} : vector<8x512xf32> to vector<8x128xf32>
    %98 = arith.negf %97 : vector<8x128xf32>
    %99 = math.exp %98 : vector<8x128xf32>
    %cst_51 = arith.constant 1.000000e+00 : f32
    %100 = vector.broadcast %cst_51 : f32 to vector<8x128xf32>
    %101 = arith.addf %100, %99 : vector<8x128xf32>
    %102 = arith.divf %100, %101 : vector<8x128xf32>
    %103 = vector.extract_strided_slice %96 {offsets = [0, 128], sizes = [8, 128], strides = [1, 1]} : vector<8x512xf32> to vector<8x128xf32>
    %104 = arith.negf %103 : vector<8x128xf32>
    %105 = math.exp %104 : vector<8x128xf32>
    %cst_52 = arith.constant 1.000000e+00 : f32
    %106 = vector.broadcast %cst_52 : f32 to vector<8x128xf32>
    %107 = arith.addf %106, %105 : vector<8x128xf32>
    %108 = arith.divf %106, %107 : vector<8x128xf32>
    %109 = vector.extract_strided_slice %96 {offsets = [0, 256], sizes = [8, 128], strides = [1, 1]} : vector<8x512xf32> to vector<8x128xf32>
    %110 = math.tanh %109 : vector<8x128xf32>
    %111 = vector.extract_strided_slice %96 {offsets = [0, 384], sizes = [8, 128], strides = [1, 1]} : vector<8x512xf32> to vector<8x128xf32>
    %112 = arith.negf %111 : vector<8x128xf32>
    %113 = math.exp %112 : vector<8x128xf32>
    %cst_53 = arith.constant 1.000000e+00 : f32
    %114 = vector.broadcast %cst_53 : f32 to vector<8x128xf32>
    %115 = arith.addf %114, %113 : vector<8x128xf32>
    %116 = arith.divf %114, %115 : vector<8x128xf32>
    %c0_54 = arith.constant 0 : index
    %c0_55 = arith.constant 0 : index
    %117 = vector.load %arg9[%c0_54, %c0_55] : memref<8x128xf32, #tpu.memory_space<vmem>>, vector<8x128xf32>
    %118 = arith.mulf %108, %117 : vector<8x128xf32>
    %119 = arith.mulf %102, %110 : vector<8x128xf32>
    %120 = arith.addf %118, %119 : vector<8x128xf32>
    %121 = math.tanh %120 : vector<8x128xf32>
    %122 = arith.mulf %116, %121 : vector<8x128xf32>
    %c0_56 = arith.constant 0 : index
    %c0_57 = arith.constant 0 : index
    %123 = vector.load %arg9[%c0_56, %c0_57] : memref<8x128xf32, #tpu.memory_space<vmem>>, vector<8x128xf32>
    tpu.vector_store %arg9[%c0_56, %c0_57], %120 {strides = array<i32>} : memref<8x128xf32, #tpu.memory_space<vmem>>, vector<8x128xf32>,
    %c0_58 = arith.constant 0 : index
    %c0_59 = arith.constant 0 : index
    %124 = vector.load %arg8[%c0_58, %c0_59] : memref<8x128xf32, #tpu.memory_space<vmem>>, vector<8x128xf32>
    tpu.vector_store %arg8[%c0_58, %c0_59], %122 {strides = array<i32>} : memref<8x128xf32, #tpu.memory_space<vmem>>, vector<8x128xf32>,
    %125 = arith.index_cast %c2_i32 : i32 to index
    %c0_60 = arith.constant 0 : index
    %c0_61 = arith.constant 0 : index
    %126 = vector.load %arg10[%125, %c0_60, %c0_61] : memref<8x8x128xf32, #tpu.memory_space<vmem>>, vector<1x8x128xf32>
    %127 = vector.shape_cast %126 : vector<1x8x128xf32> to vector<8x128xf32>
    %128 = vector.shape_cast %122 : vector<8x128xf32> to vector<1x8x128xf32>
    tpu.vector_store %arg10[%125, %c0_60, %c0_61], %128 {strides = array<i32>} : memref<8x8x128xf32, #tpu.memory_space<vmem>>, vector<1x8x128xf32>,
    %c3_i32 = arith.constant 3 : i32
    %c8_i32_62 = arith.constant 8 : i32
    %129 = arith.muli %c3_i32, %c8_i32_62 : i32
    %130 = tpu.assume_multiple %129, 8 : i32
    %131 = arith.index_cast %130 : i32 to index
    %c0_63 = arith.constant 0 : index
    %132 = vector.load %arg7[%131, %c0_63] : memref<64x512xf32, #tpu.memory_space<vmem>>, vector<8x512xf32>
    %c0_64 = arith.constant 0 : index
    %c0_65 = arith.constant 0 : index
    %133 = vector.load %arg8[%c0_64, %c0_65] : memref<8x128xf32, #tpu.memory_space<vmem>>, vector<8x128xf32>
    %cst_66 = arith.constant dense<0.000000e+00> : vector<8x512xf32>
    %134 = tpu.matmul %133, %11, %cst_66 {dimension_numbers = #tpu.dot_dimension_numbers<[1], [0], [0], [1], [0, 0, 1, 1], [], []>} : vector<8x128xf32>, vector<128x512xf32>, vector<8x512xf32> -> vector<8x512xf32>
    %135 = arith.addf %132, %134 : vector<8x512xf32>
    %136 = vector.extract_strided_slice %135 {offsets = [0, 0], sizes = [8, 128], strides = [1, 1]} : vector<8x512xf32> to vector<8x128xf32>
    %137 = arith.negf %136 : vector<8x128xf32>
    %138 = math.exp %137 : vector<8x128xf32>
    %cst_67 = arith.constant 1.000000e+00 : f32
    %139 = vector.broadcast %cst_67 : f32 to vector<8x128xf32>
    %140 = arith.addf %139, %138 : vector<8x128xf32>
    %141 = arith.divf %139, %140 : vector<8x128xf32>
    %142 = vector.extract_strided_slice %135 {offsets = [0, 128], sizes = [8, 128], strides = [1, 1]} : vector<8x512xf32> to vector<8x128xf32>
    %143 = arith.negf %142 : vector<8x128xf32>
    %144 = math.exp %143 : vector<8x128xf32>
    %cst_68 = arith.constant 1.000000e+00 : f32
    %145 = vector.broadcast %cst_68 : f32 to vector<8x128xf32>
    %146 = arith.addf %145, %144 : vector<8x128xf32>
    %147 = arith.divf %145, %146 : vector<8x128xf32>
    %148 = vector.extract_strided_slice %135 {offsets = [0, 256], sizes = [8, 128], strides = [1, 1]} : vector<8x512xf32> to vector<8x128xf32>
    %149 = math.tanh %148 : vector<8x128xf32>
    %150 = vector.extract_strided_slice %135 {offsets = [0, 384], sizes = [8, 128], strides = [1, 1]} : vector<8x512xf32> to vector<8x128xf32>
    %151 = arith.negf %150 : vector<8x128xf32>
    %152 = math.exp %151 : vector<8x128xf32>
    %cst_69 = arith.constant 1.000000e+00 : f32
    %153 = vector.broadcast %cst_69 : f32 to vector<8x128xf32>
    %154 = arith.addf %153, %152 : vector<8x128xf32>
    %155 = arith.divf %153, %154 : vector<8x128xf32>
    %c0_70 = arith.constant 0 : index
    %c0_71 = arith.constant 0 : index
    %156 = vector.load %arg9[%c0_70, %c0_71] : memref<8x128xf32, #tpu.memory_space<vmem>>, vector<8x128xf32>
    %157 = arith.mulf %147, %156 : vector<8x128xf32>
    %158 = arith.mulf %141, %149 : vector<8x128xf32>
    %159 = arith.addf %157, %158 : vector<8x128xf32>
    %160 = math.tanh %159 : vector<8x128xf32>
    %161 = arith.mulf %155, %160 : vector<8x128xf32>
    %c0_72 = arith.constant 0 : index
    %c0_73 = arith.constant 0 : index
    %162 = vector.load %arg9[%c0_72, %c0_73] : memref<8x128xf32, #tpu.memory_space<vmem>>, vector<8x128xf32>
    tpu.vector_store %arg9[%c0_72, %c0_73], %159 {strides = array<i32>} : memref<8x128xf32, #tpu.memory_space<vmem>>, vector<8x128xf32>,
    %c0_74 = arith.constant 0 : index
    %c0_75 = arith.constant 0 : index
    %163 = vector.load %arg8[%c0_74, %c0_75] : memref<8x128xf32, #tpu.memory_space<vmem>>, vector<8x128xf32>
    tpu.vector_store %arg8[%c0_74, %c0_75], %161 {strides = array<i32>} : memref<8x128xf32, #tpu.memory_space<vmem>>, vector<8x128xf32>,
    %164 = arith.index_cast %c3_i32 : i32 to index
    %c0_76 = arith.constant 0 : index
    %c0_77 = arith.constant 0 : index
    %165 = vector.load %arg10[%164, %c0_76, %c0_77] : memref<8x8x128xf32, #tpu.memory_space<vmem>>, vector<1x8x128xf32>
    %166 = vector.shape_cast %165 : vector<1x8x128xf32> to vector<8x128xf32>
    %167 = vector.shape_cast %161 : vector<8x128xf32> to vector<1x8x128xf32>
    tpu.vector_store %arg10[%164, %c0_76, %c0_77], %167 {strides = array<i32>} : memref<8x8x128xf32, #tpu.memory_space<vmem>>, vector<1x8x128xf32>,
    %c4_i32 = arith.constant 4 : i32
    %c8_i32_78 = arith.constant 8 : i32
    %168 = arith.muli %c4_i32, %c8_i32_78 : i32
    %169 = tpu.assume_multiple %168, 8 : i32
    %170 = arith.index_cast %169 : i32 to index
    %c0_79 = arith.constant 0 : index
    %171 = vector.load %arg7[%170, %c0_79] : memref<64x512xf32, #tpu.memory_space<vmem>>, vector<8x512xf32>
    %c0_80 = arith.constant 0 : index
    %c0_81 = arith.constant 0 : index
    %172 = vector.load %arg8[%c0_80, %c0_81] : memref<8x128xf32, #tpu.memory_space<vmem>>, vector<8x128xf32>
    %cst_82 = arith.constant dense<0.000000e+00> : vector<8x512xf32>
    %173 = tpu.matmul %172, %11, %cst_82 {dimension_numbers = #tpu.dot_dimension_numbers<[1], [0], [0], [1], [0, 0, 1, 1], [], []>} : vector<8x128xf32>, vector<128x512xf32>, vector<8x512xf32> -> vector<8x512xf32>
    %174 = arith.addf %171, %173 : vector<8x512xf32>
    %175 = vector.extract_strided_slice %174 {offsets = [0, 0], sizes = [8, 128], strides = [1, 1]} : vector<8x512xf32> to vector<8x128xf32>
    %176 = arith.negf %175 : vector<8x128xf32>
    %177 = math.exp %176 : vector<8x128xf32>
    %cst_83 = arith.constant 1.000000e+00 : f32
    %178 = vector.broadcast %cst_83 : f32 to vector<8x128xf32>
    %179 = arith.addf %178, %177 : vector<8x128xf32>
    %180 = arith.divf %178, %179 : vector<8x128xf32>
    %181 = vector.extract_strided_slice %174 {offsets = [0, 128], sizes = [8, 128], strides = [1, 1]} : vector<8x512xf32> to vector<8x128xf32>
    %182 = arith.negf %181 : vector<8x128xf32>
    %183 = math.exp %182 : vector<8x128xf32>
    %cst_84 = arith.constant 1.000000e+00 : f32
    %184 = vector.broadcast %cst_84 : f32 to vector<8x128xf32>
    %185 = arith.addf %184, %183 : vector<8x128xf32>
    %186 = arith.divf %184, %185 : vector<8x128xf32>
    %187 = vector.extract_strided_slice %174 {offsets = [0, 256], sizes = [8, 128], strides = [1, 1]} : vector<8x512xf32> to vector<8x128xf32>
    %188 = math.tanh %187 : vector<8x128xf32>
    %189 = vector.extract_strided_slice %174 {offsets = [0, 384], sizes = [8, 128], strides = [1, 1]} : vector<8x512xf32> to vector<8x128xf32>
    %190 = arith.negf %189 : vector<8x128xf32>
    %191 = math.exp %190 : vector<8x128xf32>
    %cst_85 = arith.constant 1.000000e+00 : f32
    %192 = vector.broadcast %cst_85 : f32 to vector<8x128xf32>
    %193 = arith.addf %192, %191 : vector<8x128xf32>
    %194 = arith.divf %192, %193 : vector<8x128xf32>
    %c0_86 = arith.constant 0 : index
    %c0_87 = arith.constant 0 : index
    %195 = vector.load %arg9[%c0_86, %c0_87] : memref<8x128xf32, #tpu.memory_space<vmem>>, vector<8x128xf32>
    %196 = arith.mulf %186, %195 : vector<8x128xf32>
    %197 = arith.mulf %180, %188 : vector<8x128xf32>
    %198 = arith.addf %196, %197 : vector<8x128xf32>
    %199 = math.tanh %198 : vector<8x128xf32>
    %200 = arith.mulf %194, %199 : vector<8x128xf32>
    %c0_88 = arith.constant 0 : index
    %c0_89 = arith.constant 0 : index
    %201 = vector.load %arg9[%c0_88, %c0_89] : memref<8x128xf32, #tpu.memory_space<vmem>>, vector<8x128xf32>
    tpu.vector_store %arg9[%c0_88, %c0_89], %198 {strides = array<i32>} : memref<8x128xf32, #tpu.memory_space<vmem>>, vector<8x128xf32>,
    %c0_90 = arith.constant 0 : index
    %c0_91 = arith.constant 0 : index
    %202 = vector.load %arg8[%c0_90, %c0_91] : memref<8x128xf32, #tpu.memory_space<vmem>>, vector<8x128xf32>
    tpu.vector_store %arg8[%c0_90, %c0_91], %200 {strides = array<i32>} : memref<8x128xf32, #tpu.memory_space<vmem>>, vector<8x128xf32>,
    %203 = arith.index_cast %c4_i32 : i32 to index
    %c0_92 = arith.constant 0 : index
    %c0_93 = arith.constant 0 : index
    %204 = vector.load %arg10[%203, %c0_92, %c0_93] : memref<8x8x128xf32, #tpu.memory_space<vmem>>, vector<1x8x128xf32>
    %205 = vector.shape_cast %204 : vector<1x8x128xf32> to vector<8x128xf32>
    %206 = vector.shape_cast %200 : vector<8x128xf32> to vector<1x8x128xf32>
    tpu.vector_store %arg10[%203, %c0_92, %c0_93], %206 {strides = array<i32>} : memref<8x8x128xf32, #tpu.memory_space<vmem>>, vector<1x8x128xf32>,
    %c5_i32 = arith.constant 5 : i32
    %c8_i32_94 = arith.constant 8 : i32
    %207 = arith.muli %c5_i32, %c8_i32_94 : i32
    %208 = tpu.assume_multiple %207, 8 : i32
    %209 = arith.index_cast %208 : i32 to index
    %c0_95 = arith.constant 0 : index
    %210 = vector.load %arg7[%209, %c0_95] : memref<64x512xf32, #tpu.memory_space<vmem>>, vector<8x512xf32>
    %c0_96 = arith.constant 0 : index
    %c0_97 = arith.constant 0 : index
    %211 = vector.load %arg8[%c0_96, %c0_97] : memref<8x128xf32, #tpu.memory_space<vmem>>, vector<8x128xf32>
    %cst_98 = arith.constant dense<0.000000e+00> : vector<8x512xf32>
    %212 = tpu.matmul %211, %11, %cst_98 {dimension_numbers = #tpu.dot_dimension_numbers<[1], [0], [0], [1], [0, 0, 1, 1], [], []>} : vector<8x128xf32>, vector<128x512xf32>, vector<8x512xf32> -> vector<8x512xf32>
    %213 = arith.addf %210, %212 : vector<8x512xf32>
    %214 = vector.extract_strided_slice %213 {offsets = [0, 0], sizes = [8, 128], strides = [1, 1]} : vector<8x512xf32> to vector<8x128xf32>
    %215 = arith.negf %214 : vector<8x128xf32>
    %216 = math.exp %215 : vector<8x128xf32>
    %cst_99 = arith.constant 1.000000e+00 : f32
    %217 = vector.broadcast %cst_99 : f32 to vector<8x128xf32>
    %218 = arith.addf %217, %216 : vector<8x128xf32>
    %219 = arith.divf %217, %218 : vector<8x128xf32>
    %220 = vector.extract_strided_slice %213 {offsets = [0, 128], sizes = [8, 128], strides = [1, 1]} : vector<8x512xf32> to vector<8x128xf32>
    %221 = arith.negf %220 : vector<8x128xf32>
    %222 = math.exp %221 : vector<8x128xf32>
    %cst_100 = arith.constant 1.000000e+00 : f32
    %223 = vector.broadcast %cst_100 : f32 to vector<8x128xf32>
    %224 = arith.addf %223, %222 : vector<8x128xf32>
    %225 = arith.divf %223, %224 : vector<8x128xf32>
    %226 = vector.extract_strided_slice %213 {offsets = [0, 256], sizes = [8, 128], strides = [1, 1]} : vector<8x512xf32> to vector<8x128xf32>
    %227 = math.tanh %226 : vector<8x128xf32>
    %228 = vector.extract_strided_slice %213 {offsets = [0, 384], sizes = [8, 128], strides = [1, 1]} : vector<8x512xf32> to vector<8x128xf32>
    %229 = arith.negf %228 : vector<8x128xf32>
    %230 = math.exp %229 : vector<8x128xf32>
    %cst_101 = arith.constant 1.000000e+00 : f32
    %231 = vector.broadcast %cst_101 : f32 to vector<8x128xf32>
    %232 = arith.addf %231, %230 : vector<8x128xf32>
    %233 = arith.divf %231, %232 : vector<8x128xf32>
    %c0_102 = arith.constant 0 : index
    %c0_103 = arith.constant 0 : index
    %234 = vector.load %arg9[%c0_102, %c0_103] : memref<8x128xf32, #tpu.memory_space<vmem>>, vector<8x128xf32>
    %235 = arith.mulf %225, %234 : vector<8x128xf32>
    %236 = arith.mulf %219, %227 : vector<8x128xf32>
    %237 = arith.addf %235, %236 : vector<8x128xf32>
    %238 = math.tanh %237 : vector<8x128xf32>
    %239 = arith.mulf %233, %238 : vector<8x128xf32>
    %c0_104 = arith.constant 0 : index
    %c0_105 = arith.constant 0 : index
    %240 = vector.load %arg9[%c0_104, %c0_105] : memref<8x128xf32, #tpu.memory_space<vmem>>, vector<8x128xf32>
    tpu.vector_store %arg9[%c0_104, %c0_105], %237 {strides = array<i32>} : memref<8x128xf32, #tpu.memory_space<vmem>>, vector<8x128xf32>,
    %c0_106 = arith.constant 0 : index
    %c0_107 = arith.constant 0 : index
    %241 = vector.load %arg8[%c0_106, %c0_107] : memref<8x128xf32, #tpu.memory_space<vmem>>, vector<8x128xf32>
    tpu.vector_store %arg8[%c0_106, %c0_107], %239 {strides = array<i32>} : memref<8x128xf32, #tpu.memory_space<vmem>>, vector<8x128xf32>,
    %242 = arith.index_cast %c5_i32 : i32 to index
    %c0_108 = arith.constant 0 : index
    %c0_109 = arith.constant 0 : index
    %243 = vector.load %arg10[%242, %c0_108, %c0_109] : memref<8x8x128xf32, #tpu.memory_space<vmem>>, vector<1x8x128xf32>
    %244 = vector.shape_cast %243 : vector<1x8x128xf32> to vector<8x128xf32>
    %245 = vector.shape_cast %239 : vector<8x128xf32> to vector<1x8x128xf32>
    tpu.vector_store %arg10[%242, %c0_108, %c0_109], %245 {strides = array<i32>} : memref<8x8x128xf32, #tpu.memory_space<vmem>>, vector<1x8x128xf32>,
    %c6_i32 = arith.constant 6 : i32
    %c8_i32_110 = arith.constant 8 : i32
    %246 = arith.muli %c6_i32, %c8_i32_110 : i32
    %247 = tpu.assume_multiple %246, 8 : i32
    %248 = arith.index_cast %247 : i32 to index
    %c0_111 = arith.constant 0 : index
    %249 = vector.load %arg7[%248, %c0_111] : memref<64x512xf32, #tpu.memory_space<vmem>>, vector<8x512xf32>
    %c0_112 = arith.constant 0 : index
    %c0_113 = arith.constant 0 : index
    %250 = vector.load %arg8[%c0_112, %c0_113] : memref<8x128xf32, #tpu.memory_space<vmem>>, vector<8x128xf32>
    %cst_114 = arith.constant dense<0.000000e+00> : vector<8x512xf32>
    %251 = tpu.matmul %250, %11, %cst_114 {dimension_numbers = #tpu.dot_dimension_numbers<[1], [0], [0], [1], [0, 0, 1, 1], [], []>} : vector<8x128xf32>, vector<128x512xf32>, vector<8x512xf32> -> vector<8x512xf32>
    %252 = arith.addf %249, %251 : vector<8x512xf32>
    %253 = vector.extract_strided_slice %252 {offsets = [0, 0], sizes = [8, 128], strides = [1, 1]} : vector<8x512xf32> to vector<8x128xf32>
    %254 = arith.negf %253 : vector<8x128xf32>
    %255 = math.exp %254 : vector<8x128xf32>
    %cst_115 = arith.constant 1.000000e+00 : f32
    %256 = vector.broadcast %cst_115 : f32 to vector<8x128xf32>
    %257 = arith.addf %256, %255 : vector<8x128xf32>
    %258 = arith.divf %256, %257 : vector<8x128xf32>
    %259 = vector.extract_strided_slice %252 {offsets = [0, 128], sizes = [8, 128], strides = [1, 1]} : vector<8x512xf32> to vector<8x128xf32>
    %260 = arith.negf %259 : vector<8x128xf32>
    %261 = math.exp %260 : vector<8x128xf32>
    %cst_116 = arith.constant 1.000000e+00 : f32
    %262 = vector.broadcast %cst_116 : f32 to vector<8x128xf32>
    %263 = arith.addf %262, %261 : vector<8x128xf32>
    %264 = arith.divf %262, %263 : vector<8x128xf32>
    %265 = vector.extract_strided_slice %252 {offsets = [0, 256], sizes = [8, 128], strides = [1, 1]} : vector<8x512xf32> to vector<8x128xf32>
    %266 = math.tanh %265 : vector<8x128xf32>
    %267 = vector.extract_strided_slice %252 {offsets = [0, 384], sizes = [8, 128], strides = [1, 1]} : vector<8x512xf32> to vector<8x128xf32>
    %268 = arith.negf %267 : vector<8x128xf32>
    %269 = math.exp %268 : vector<8x128xf32>
    %cst_117 = arith.constant 1.000000e+00 : f32
    %270 = vector.broadcast %cst_117 : f32 to vector<8x128xf32>
    %271 = arith.addf %270, %269 : vector<8x128xf32>
    %272 = arith.divf %270, %271 : vector<8x128xf32>
    %c0_118 = arith.constant 0 : index
    %c0_119 = arith.constant 0 : index
    %273 = vector.load %arg9[%c0_118, %c0_119] : memref<8x128xf32, #tpu.memory_space<vmem>>, vector<8x128xf32>
    %274 = arith.mulf %264, %273 : vector<8x128xf32>
    %275 = arith.mulf %258, %266 : vector<8x128xf32>
    %276 = arith.addf %274, %275 : vector<8x128xf32>
    %277 = math.tanh %276 : vector<8x128xf32>
    %278 = arith.mulf %272, %277 : vector<8x128xf32>
    %c0_120 = arith.constant 0 : index
    %c0_121 = arith.constant 0 : index
    %279 = vector.load %arg9[%c0_120, %c0_121] : memref<8x128xf32, #tpu.memory_space<vmem>>, vector<8x128xf32>
    tpu.vector_store %arg9[%c0_120, %c0_121], %276 {strides = array<i32>} : memref<8x128xf32, #tpu.memory_space<vmem>>, vector<8x128xf32>,
    %c0_122 = arith.constant 0 : index
    %c0_123 = arith.constant 0 : index
    %280 = vector.load %arg8[%c0_122, %c0_123] : memref<8x128xf32, #tpu.memory_space<vmem>>, vector<8x128xf32>
    tpu.vector_store %arg8[%c0_122, %c0_123], %278 {strides = array<i32>} : memref<8x128xf32, #tpu.memory_space<vmem>>, vector<8x128xf32>,
    %281 = arith.index_cast %c6_i32 : i32 to index
    %c0_124 = arith.constant 0 : index
    %c0_125 = arith.constant 0 : index
    %282 = vector.load %arg10[%281, %c0_124, %c0_125] : memref<8x8x128xf32, #tpu.memory_space<vmem>>, vector<1x8x128xf32>
    %283 = vector.shape_cast %282 : vector<1x8x128xf32> to vector<8x128xf32>
    %284 = vector.shape_cast %278 : vector<8x128xf32> to vector<1x8x128xf32>
    tpu.vector_store %arg10[%281, %c0_124, %c0_125], %284 {strides = array<i32>} : memref<8x8x128xf32, #tpu.memory_space<vmem>>, vector<1x8x128xf32>,
    %c7_i32 = arith.constant 7 : i32
    %c8_i32_126 = arith.constant 8 : i32
    %285 = arith.muli %c7_i32, %c8_i32_126 : i32
    %286 = tpu.assume_multiple %285, 8 : i32
    %287 = arith.index_cast %286 : i32 to index
    %c0_127 = arith.constant 0 : index
    %288 = vector.load %arg7[%287, %c0_127] : memref<64x512xf32, #tpu.memory_space<vmem>>, vector<8x512xf32>
    %c0_128 = arith.constant 0 : index
    %c0_129 = arith.constant 0 : index
    %289 = vector.load %arg8[%c0_128, %c0_129] : memref<8x128xf32, #tpu.memory_space<vmem>>, vector<8x128xf32>
    %cst_130 = arith.constant dense<0.000000e+00> : vector<8x512xf32>
    %290 = tpu.matmul %289, %11, %cst_130 {dimension_numbers = #tpu.dot_dimension_numbers<[1], [0], [0], [1], [0, 0, 1, 1], [], []>} : vector<8x128xf32>, vector<128x512xf32>, vector<8x512xf32> -> vector<8x512xf32>
    %291 = arith.addf %288, %290 : vector<8x512xf32>
    %292 = vector.extract_strided_slice %291 {offsets = [0, 0], sizes = [8, 128], strides = [1, 1]} : vector<8x512xf32> to vector<8x128xf32>
    %293 = arith.negf %292 : vector<8x128xf32>
    %294 = math.exp %293 : vector<8x128xf32>
    %cst_131 = arith.constant 1.000000e+00 : f32
    %295 = vector.broadcast %cst_131 : f32 to vector<8x128xf32>
    %296 = arith.addf %295, %294 : vector<8x128xf32>
    %297 = arith.divf %295, %296 : vector<8x128xf32>
    %298 = vector.extract_strided_slice %291 {offsets = [0, 128], sizes = [8, 128], strides = [1, 1]} : vector<8x512xf32> to vector<8x128xf32>
    %299 = arith.negf %298 : vector<8x128xf32>
    %300 = math.exp %299 : vector<8x128xf32>
    %cst_132 = arith.constant 1.000000e+00 : f32
    %301 = vector.broadcast %cst_132 : f32 to vector<8x128xf32>
    %302 = arith.addf %301, %300 : vector<8x128xf32>
    %303 = arith.divf %301, %302 : vector<8x128xf32>
    %304 = vector.extract_strided_slice %291 {offsets = [0, 256], sizes = [8, 128], strides = [1, 1]} : vector<8x512xf32> to vector<8x128xf32>
    %305 = math.tanh %304 : vector<8x128xf32>
    %306 = vector.extract_strided_slice %291 {offsets = [0, 384], sizes = [8, 128], strides = [1, 1]} : vector<8x512xf32> to vector<8x128xf32>
    %307 = arith.negf %306 : vector<8x128xf32>
    %308 = math.exp %307 : vector<8x128xf32>
    %cst_133 = arith.constant 1.000000e+00 : f32
    %309 = vector.broadcast %cst_133 : f32 to vector<8x128xf32>
    %310 = arith.addf %309, %308 : vector<8x128xf32>
    %311 = arith.divf %309, %310 : vector<8x128xf32>
    %c0_134 = arith.constant 0 : index
    %c0_135 = arith.constant 0 : index
    %312 = vector.load %arg9[%c0_134, %c0_135] : memref<8x128xf32, #tpu.memory_space<vmem>>, vector<8x128xf32>
    %313 = arith.mulf %303, %312 : vector<8x128xf32>
    %314 = arith.mulf %297, %305 : vector<8x128xf32>
    %315 = arith.addf %313, %314 : vector<8x128xf32>
    %316 = math.tanh %315 : vector<8x128xf32>
    %317 = arith.mulf %311, %316 : vector<8x128xf32>
    %c0_136 = arith.constant 0 : index
    %c0_137 = arith.constant 0 : index
    %318 = vector.load %arg9[%c0_136, %c0_137] : memref<8x128xf32, #tpu.memory_space<vmem>>, vector<8x128xf32>
    tpu.vector_store %arg9[%c0_136, %c0_137], %315 {strides = array<i32>} : memref<8x128xf32, #tpu.memory_space<vmem>>, vector<8x128xf32>,
    %c0_138 = arith.constant 0 : index
    %c0_139 = arith.constant 0 : index
    %319 = vector.load %arg8[%c0_138, %c0_139] : memref<8x128xf32, #tpu.memory_space<vmem>>, vector<8x128xf32>
    tpu.vector_store %arg8[%c0_138, %c0_139], %317 {strides = array<i32>} : memref<8x128xf32, #tpu.memory_space<vmem>>, vector<8x128xf32>,
    %320 = arith.index_cast %c7_i32 : i32 to index
    %c0_140 = arith.constant 0 : index
    %c0_141 = arith.constant 0 : index
    %321 = vector.load %arg10[%320, %c0_140, %c0_141] : memref<8x8x128xf32, #tpu.memory_space<vmem>>, vector<1x8x128xf32>
    %322 = vector.shape_cast %321 : vector<1x8x128xf32> to vector<8x128xf32>
    %323 = vector.shape_cast %317 : vector<8x128xf32> to vector<1x8x128xf32>
    tpu.vector_store %arg10[%320, %c0_140, %c0_141], %323 {strides = array<i32>} : memref<8x8x128xf32, #tpu.memory_space<vmem>>, vector<1x8x128xf32>,
    %c8_i32_142 = arith.constant 8 : i32
    %c0_143 = arith.constant 0 : index
    %c0_144 = arith.constant 0 : index
    %324 = vector.load %arg5[%c0_143, %c0_144] : memref<16x8xf32, #tpu.memory_space<vmem>>, vector<16x8xf32>
    %c0_145 = arith.constant 0 : index
    %c0_146 = arith.constant 0 : index
    %c0_147 = arith.constant 0 : index
    %325 = vector.load %arg10[%c0_145, %c0_146, %c0_147] : memref<8x8x128xf32, #tpu.memory_space<vmem>>, vector<8x1x128xf32>
    %326 = vector.shape_cast %325 : vector<8x1x128xf32> to vector<8x128xf32>
    %cst_148 = arith.constant dense<0.000000e+00> : vector<16x128xf32>
    %327 = tpu.matmul %324, %326, %cst_148 {dimension_numbers = #tpu.dot_dimension_numbers<[1], [0], [0], [1], [0, 0, 1, 1], [], []>} : vector<16x8xf32>, vector<8x128xf32>, vector<16x128xf32> -> vector<16x128xf32>
    %c0_149 = arith.constant 0 : index
    %c0_150 = arith.constant 0 : index
    %c0_151 = arith.constant 0 : index
    %328 = vector.load %arg6[%c0_149, %c0_150, %c0_151] : memref<2x16x128xf32, #tpu.memory_space<vmem>>, vector<1x16x128xf32>
    %329 = vector.shape_cast %328 : vector<1x16x128xf32> to vector<16x128xf32>
    %330 = vector.shape_cast %327 : vector<16x128xf32> to vector<1x16x128xf32>
    tpu.vector_store %arg6[%c0_149, %c0_150, %c0_151], %330 {strides = array<i32>} : memref<2x16x128xf32, #tpu.memory_space<vmem>>, vector<1x16x128xf32>,
    %c0_152 = arith.constant 0 : index
    %c1 = arith.constant 1 : index
    %c0_153 = arith.constant 0 : index
    %331 = vector.load %arg10[%c0_152, %c1, %c0_153] : memref<8x8x128xf32, #tpu.memory_space<vmem>>, vector<8x1x128xf32>
    %332 = vector.shape_cast %331 : vector<8x1x128xf32> to vector<8x128xf32>
    %cst_154 = arith.constant dense<0.000000e+00> : vector<16x128xf32>
    %333 = tpu.matmul %324, %332, %cst_154 {dimension_numbers = #tpu.dot_dimension_numbers<[1], [0], [0], [1], [0, 0, 1, 1], [], []>} : vector<16x8xf32>, vector<8x128xf32>, vector<16x128xf32> -> vector<16x128xf32>
    %c1_155 = arith.constant 1 : index
    %c0_156 = arith.constant 0 : index
    %c0_157 = arith.constant 0 : index
    %334 = vector.load %arg6[%c1_155, %c0_156, %c0_157] : memref<2x16x128xf32, #tpu.memory_space<vmem>>, vector<1x16x128xf32>
    %335 = vector.shape_cast %334 : vector<1x16x128xf32> to vector<16x128xf32>
    %336 = vector.shape_cast %333 : vector<16x128xf32> to vector<1x16x128xf32>
    tpu.vector_store %arg6[%c1_155, %c0_156, %c0_157], %336 {strides = array<i32>} : memref<2x16x128xf32, #tpu.memory_space<vmem>>, vector<1x16x128xf32>,
    return
  }
  func.func @transform_0(%arg0: i32) -> (i32, i32) {
    %c0_i32 = arith.constant 0 : i32
    %c0_i32_0 = arith.constant 0 : i32
    %c0_i32_1 = arith.constant 0 : i32
    return %c0_i32, %c0_i32_0 : i32, i32
  }
  func.func @transform_1(%arg0: i32) -> (i32, i32) {
    %c0_i32 = arith.constant 0 : i32
    %c0_i32_0 = arith.constant 0 : i32
    %c0_i32_1 = arith.constant 0 : i32
    return %c0_i32, %c0_i32_0 : i32, i32
  }
  func.func @transform_2(%arg0: i32) -> (i32, i32) {
    %c0_i32 = arith.constant 0 : i32
    %c0_i32_0 = arith.constant 0 : i32
    %c0_i32_1 = arith.constant 0 : i32
    return %c0_i32, %c0_i32_0 : i32, i32
  }
  func.func @transform_3(%arg0: i32) -> (i32, i32) {
    %c0_i32 = arith.constant 0 : i32
    %c0_i32_0 = arith.constant 0 : i32
    %c0_i32_1 = arith.constant 0 : i32
    return %c0_i32, %c0_i32_0 : i32, i32
  }
  func.func @transform_4(%arg0: i32) -> (i32, i32) {
    %c0_i32 = arith.constant 0 : i32
    %c0_i32_0 = arith.constant 0 : i32
    %c0_i32_1 = arith.constant 0 : i32
    return %c0_i32, %c0_i32_0 : i32, i32
  }
  func.func @transform_5(%arg0: i32) -> (i32, i32, i32) {
    %c0_i32 = arith.constant 0 : i32
    %c0_i32_0 = arith.constant 0 : i32
    %c0_i32_1 = arith.constant 0 : i32
    %c0_i32_2 = arith.constant 0 : i32
    return %c0_i32, %c0_i32_0, %c0_i32_1 : i32, i32, i32
  }
}

</mosaic_0001>

<bundles_post_ra>
// kernel: skip_lstm_forward.1
= control target key start
LH: loop header
LB: loop body
LE: loop exit
PB: predicated region body
PF: predicated region fallthrough
CT: control target
= control target key end

     0   :  { %vm55_vm0 = vcmask 64512   ;;  %v3838_v5 = vmov 0.0   ;;  %s3832_s0 = inlined_call_operand.vmem [shape: f32[64,8], index: 0, kind: input, shape index: {}]   ;;  %s3833_s1 = inlined_call_operand.vmem [shape: f32[8,512], index: 1, kind: input, shape index: {}]   ;;  %s3834_s2 = inlined_call_operand.vmem [shape: f32[128,512], index: 2, kind: input, shape index: {}]   ;;  %s3835_s3 = inlined_call_operand.vmem [shape: f32[1,512], index: 3, kind: input, shape index: {}]   ;;  %s3836_s4 = inlined_call_operand.vmem [shape: f32[16,8], index: 4, kind: input, shape index: {}]   ;;  %s3837_s5 = inlined_call_operand.hbm [shape: f32[2,16,128], index: 5, kind: output, shape index: {}]  }
   0x1   :  { %v30_v0 = vld [vmem:[%s3833_s1 + $0x8] sm:$0xff]  ;;  %v32_v1 = vld [vmem:[%s3833_s1 + $0x18] sm:$0xff]  ;;  %v29_v2 = vld [vmem:[%s3833_s1] sm:$0xff]  ;;  %144 = vmatprep.mubr.f32.mxu0 %v3838_v5  ;;  %257 = vmatprep.mubr.f32.mxu1 %v3838_v5 }
   0x2   :  { %110 = vmatprep.subr.mxu0 %v30_v0  ;;  %223 = vmatprep.subr.mxu1 %v32_v1  ;;  %v31_v3 = vld [vmem:[%s3833_s1 + $0x10] sm:$0xff]  ;;  %v21_v4 = vld [vmem:[%s3832_s0] sm:$0xff]  ;;  %v2453_v6 = vld [vmem:[%s3834_s2 + $0x1e8] sm:$0xff] }
   0x3   :  { %111 = vmatpush1.msra.mxu0 %v29_v2  ;;  %3926 = vst [vmem:[#allocation9_spill] sm:$0xff] %v2453_v6  ;;  %v2458_v7 = vld [vmem:[%s3834_s2 + $0x1f8] sm:$0xff]  ;;  %224 = vmatpush1.msra.mxu1 %v31_v3  ;;  %v2464_v8 = vld [vmem:[%s3834_s2 + $0x1e0] sm:$0xff]  ;;  %v2469_v9 = vld [vmem:[%s3834_s2 + $0x1f0] sm:$0xff] }
   0x4   :  { %3927 = vst [vmem:[#allocation10_spill] sm:$0xff] %v2458_v7  ;;  %2122 = vmatmul.mubr.msk.f32.vlgmr.msra.gmra.mxu0 %vm55_vm0, %v21_v4  ;;  %2130 = vmatmul.mubr.msk.f32.vlgmr.msra.gmra.mxu1 %vm55_vm0, %v21_v4  ;;  %v2476_v10 = vld [vmem:[%s3834_s2 + $0x1c8] sm:$0xff]  ;;  %v2481_v11 = vld [vmem:[%s3834_s2 + $0x1d8] sm:$0xff]  ;;  %v2490_v12 = vld [vmem:[%s3834_s2 + $0x1c0] sm:$0xff] }
   0x5   :  { %412 = vmatprep.subr.mxu0 %v2453_v6  ;;  %483 = vmatprep.subr.mxu1 %v2458_v7  ;;  %v2495_v13 = vld [vmem:[%s3834_s2 + $0x1d0] sm:$0xff]  ;;  %v22_v14 = vld [vmem:[%s3832_s0 + $0x8] sm:$0xff]  ;;  %v2512_v16 = vld [vmem:[%s3834_s2 + $0x1b8] sm:$0xff] }
   0x6   :  { %413 = vmatpush1.msra.mxu0 %v2464_v8  ;;  %484 = vmatpush1.msra.mxu1 %v2469_v9  ;;  %v2507_v15 = vld [vmem:[%s3834_s2 + $0x1a8] sm:$0xff]  ;;  %v2519_v17 = vld [vmem:[%s3834_s2 + $0x1a0] sm:$0xff]  ;;  %v2524_v18 = vld [vmem:[%s3834_s2 + $0x1b0] sm:$0xff] }
   0x7   :  { %414 = vmatprep.subr.mxu0 %v2476_v10  ;;  %485 = vmatprep.subr.mxu1 %v2481_v11  ;;  %v2531_v19 = vld [vmem:[%s3834_s2 + $0x188] sm:$0xff]  ;;  %v2536_v20 = vld [vmem:[%s3834_s2 + $0x198] sm:$0xff]  ;;  %v2545_v21 = vld [vmem:[%s3834_s2 + $0x180] sm:$0xff] }
   0x8   :  { %150 = vmatprep.mubr.f32.mxu0 %v3838_v5  ;;  %263 = vmatprep.mubr.f32.mxu1 %v3838_v5  ;;  %v2550_v22 = vld [vmem:[%s3834_s2 + $0x190] sm:$0xff]  ;;  %v2562_v24 = vld [vmem:[%s3834_s2 + $0x168] sm:$0xff]  ;;  %v2567_v25 = vld [vmem:[%s3834_s2 + $0x178] sm:$0xff] }
   0x9   :  { %415 = vmatpush1.msra.mxu0 %v2490_v12  ;;  %486 = vmatpush1.msra.mxu1 %v2495_v13  ;;  %v23_v23 = vld [vmem:[%s3832_s0 + $0x10] sm:$0xff]  ;;  %v2574_v26 = vld [vmem:[%s3834_s2 + $0x160] sm:$0xff]  ;;  %v2586_v28 = vld [vmem:[%s3834_s2 + $0x148] sm:$0xff] }
   0xa   :  { %2123 = vmatmul.mubr.msk.f32.gmra.mxu0 %vm55_vm0, %v22_v14  ;;  %2131 = vmatmul.mubr.msk.f32.gmra.mxu1 %vm55_vm0, %v22_v14  ;;  %v2579_v27 = vld [vmem:[%s3834_s2 + $0x170] sm:$0xff]  ;;  %v2591_v29 = vld [vmem:[%s3834_s2 + $0x158] sm:$0xff]  ;;  %v2600_v30 = vld [vmem:[%s3834_s2 + $0x140] sm:$0xff] }
   0xb   :  { %416 = vmatprep.subr.mxu0 %v2507_v15  ;;  %487 = vmatprep.subr.mxu1 %v2512_v16  ;;  %v2605_v31 = vld [vmem:[%s3834_s2 + $0x150] sm:$0xff]  ;;  %v24_v32 = vld [vmem:[%s3832_s0 + $0x18] sm:$0xff]  ;;  %v2617_v33 = vld [vmem:[%s3834_s2 + $0x128] sm:$0xff] }
   0xc   :  { %417 = vmatpush1.msra.mxu0 %v2519_v17  ;;  %488 = vmatpush1.msra.mxu1 %v2524_v18  ;;  %v2622_v34 = vld [vmem:[%s3834_s2 + $0x138] sm:$0xff]  ;;  %v2629_v35 = vld [vmem:[%s3834_s2 + $0x120] sm:$0xff]  ;;  %v2634_v36 = vld [vmem:[%s3834_s2 + $0x130] sm:$0xff] }
   0xd   :  { %418 = vmatprep.subr.mxu0 %v2531_v19  ;;  %489 = vmatprep.subr.mxu1 %v2536_v20  ;;  %v2641_v37 = vld [vmem:[%s3834_s2 + $0x108] sm:$0xff]  ;;  %v2646_v38 = vld [vmem:[%s3834_s2 + $0x118] sm:$0xff]  ;;  %v2655_v39 = vld [vmem:[%s3834_s2 + $0x100] sm:$0xff] }
   0xe   :  { %156 = vmatprep.mubr.f32.mxu0 %v3838_v5  ;;  %269 = vmatprep.mubr.f32.mxu1 %v3838_v5  ;;  %v2660_v40 = vld [vmem:[%s3834_s2 + $0x110] sm:$0xff]  ;;  %v25_v41 = vld [vmem:[%s3832_s0 + $0x20] sm:$0xff] }
   0xf   :  { %419 = vmatpush1.msra.mxu0 %v2545_v21  ;;  %490 = vmatpush1.msra.mxu1 %v2550_v22 }
  0x10   :  { %2124 = vmatmul.mubr.msk.f32.gmra.mxu0 %vm55_vm0, %v23_v23  ;;  %2132 = vmatmul.mubr.msk.f32.gmra.mxu1 %vm55_vm0, %v23_v23 }
  0x11   :  { %420 = vmatprep.subr.mxu0 %v2562_v24  ;;  %491 = vmatprep.subr.mxu1 %v2567_v25 }
  0x12   :  { %421 = vmatpush1.msra.mxu0 %v2574_v26  ;;  %492 = vmatpush1.msra.mxu1 %v2579_v27 }
  0x13   :  { %422 = vmatprep.subr.mxu0 %v2586_v28  ;;  %493 = vmatprep.subr.mxu1 %v2591_v29 }
  0x14   :  { %162 = vmatprep.mubr.f32.mxu0 %v3838_v5  ;;  %275 = vmatprep.mubr.f32.mxu1 %v3838_v5 }
  0x15   :  { %423 = vmatpush1.msra.mxu0 %v2600_v30  ;;  %494 = vmatpush1.msra.mxu1 %v2605_v31 }
  0x16   :  { %2125 = vmatmul.mubr.msk.f32.gmra.mxu0 %vm55_vm0, %v24_v32  ;;  %2133 = vmatmul.mubr.msk.f32.gmra.mxu1 %vm55_vm0, %v24_v32 }
  0x17   :  { %424 = vmatprep.subr.mxu0 %v2617_v33  ;;  %495 = vmatprep.subr.mxu1 %v2622_v34 }
  0x18   :  { %425 = vmatpush1.msra.mxu0 %v2629_v35  ;;  %496 = vmatpush1.msra.mxu1 %v2634_v36 }
  0x19   :  { %426 = vmatprep.subr.mxu0 %v2641_v37  ;;  %497 = vmatprep.subr.mxu1 %v2646_v38 }
  0x1a   :  { %10 = vsyncpa [#allocation7], 0  ;;  %168 = vmatprep.mubr.f32.mxu0 %v3838_v5  ;;  %281 = vmatprep.mubr.f32.mxu1 %v3838_v5  ;;  %v2672_v42 = vld [vmem:[%s3834_s2 + $0xe8] sm:$0xff]  ;;  %v2677_v43 = vld [vmem:[%s3834_s2 + $0xf8] sm:$0xff]  ;;  %vm1886_vm1 = vcmask 1041409   ;;  %vm1889_vm2 = vcmask 1042434  }
  0x1b   :  { %427 = vmatpush1.msra.mxu0 %v2655_v39  ;;  %498 = vmatpush1.msra.mxu1 %v2660_v40  ;;  %v2684_v44 = vld [vmem:[%s3834_s2 + $0xe0] sm:$0xff]  ;;  %v2689_v45 = vld [vmem:[%s3834_s2 + $0xf0] sm:$0xff]  ;;  %v2696_v46 = vld [vmem:[%s3834_s2 + $0xc8] sm:$0xff]  ;;  %vm1892_vm3 = vcmask 1043459   ;;  %vm1895_vm4 = vcmask 1044484   ;;  %vm1898_vm5 = vcmask 1045509  }
  0x1c   :  { %2126 = vmatmul.mubr.msk.f32.gmra.mxu0 %vm55_vm0, %v25_v41  ;;  %2134 = vmatmul.mubr.msk.f32.gmra.mxu1 %vm55_vm0, %v25_v41  ;;  %v2701_v47 = vld [vmem:[%s3834_s2 + $0xd8] sm:$0xff]  ;;  %v2710_v48 = vld [vmem:[%s3834_s2 + $0xc0] sm:$0xff]  ;;  %v2715_v49 = vld [vmem:[%s3834_s2 + $0xd0] sm:$0xff]  ;;  %vm1901_vm6 = vcmask 1046534   ;;  %vm1904_vm7 = vcmask 1047559   ;;  %s2401_s1 = smov [#allocation6]  }
  0x1d   :  { %428 = vmatprep.subr.mxu0 %v2672_v42  ;;  %499 = vmatprep.subr.mxu1 %v2677_v43  ;;  %v26_v50 = vld [vmem:[%s3832_s0 + $0x28] sm:$0xff]  ;;  %v2732_v52 = vld [vmem:[%s3834_s2 + $0xb8] sm:$0xff]  ;;  %v2739_v53 = vld [vmem:[%s3834_s2 + $0xa0] sm:$0xff]  ;;  %s2104_s7 = sshll.u32 %s2401_s1, 4  ;;  %s2105_s7 = int_to_ptr.vmem [resolvable:$true] %s2104_s7 }
  0x1e   :  { %429 = vmatpush1.msra.mxu0 %v2684_v44  ;;  %500 = vmatpush1.msra.mxu1 %v2689_v45  ;;  %v2727_v51 = vld [vmem:[%s3834_s2 + $0xa8] sm:$0xff]  ;;  %v2744_v54 = vld [vmem:[%s3834_s2 + $0xb0] sm:$0xff]  ;;  %v2756_v56 = vld [vmem:[%s3834_s2 + $0x98] sm:$0xff]  ;;  %p2383_p1 = scmp.lt.s32.totalorder %s2105_s7, %s2105_s7 }
  0x1f   :  { %430 = vmatprep.subr.mxu0 %v2696_v46  ;;  %501 = vmatprep.subr.mxu1 %v2701_v47  ;;  %v2751_v55 = vld [vmem:[%s3834_s2 + $0x88] sm:$0xff]  ;;  %3929 = vst [vmem:[#allocation12_spill] sm:$0xff] %v2756_v56  ;;  %v2765_v57 = vld [vmem:[%s3834_s2 + $0x80] sm:$0xff]  ;;  %v2770_v58 = vld [vmem:[%s3834_s2 + $0x90] sm:$0xff] }
  0x20   :  { %174 = vmatprep.mubr.f32.mxu0 %v3838_v5  ;;  %287 = vmatprep.mubr.f32.mxu1 %v3838_v5  ;;  %3928 = vst [vmem:[#allocation11_spill] sm:$0xff] %v2751_v55  ;;  %3930 = vst [vmem:[#allocation13_spill] sm:$0xff] %v2765_v57  ;;  %v27_v59 = vld [vmem:[%s3832_s0 + $0x30] sm:$0xff]  ;;  %v2782_v60 = vld [vmem:[%s3834_s2 + $0x68] sm:$0xff] }
  0x21   :  { %431 = vmatpush1.msra.mxu0 %v2710_v48  ;;  %502 = vmatpush1.msra.mxu1 %v2715_v49  ;;  %3931 = vst [vmem:[#allocation14_spill] sm:$0xff] %v2770_v58  ;;  %3932 = vst [vmem:[#allocation15_spill] sm:$0xff] %v2782_v60  ;;  %v2787_v61 = vld [vmem:[%s3834_s2 + $0x78] sm:$0xff]  ;;  %v2794_v62 = vld [vmem:[%s3834_s2 + $0x60] sm:$0xff] }
  0x22   :  { %2127 = vmatmul.mubr.msk.f32.gmra.mxu0 %vm55_vm0, %v26_v50  ;;  %2135 = vmatmul.mubr.msk.f32.gmra.mxu1 %vm55_vm0, %v26_v50  ;;  %3933 = vst [vmem:[#allocation16_spill] sm:$0xff] %v2787_v61  ;;  %3934 = vst [vmem:[#allocation17_spill] sm:$0xff] %v2794_v62  ;;  %v2799_v63 = vld [vmem:[%s3834_s2 + $0x70] sm:$0xff]  ;;  %v2806_v0 = vld [vmem:[%s3834_s2 + $0x48] sm:$0xff] }
  0x23   :  { %432 = vmatprep.subr.mxu0 %v2727_v51  ;;  %503 = vmatprep.subr.mxu1 %v2732_v52  ;;  %3935 = vst [vmem:[#allocation18_spill] sm:$0xff] %v2799_v63  ;;  %3936 = vst [vmem:[#allocation19_spill] sm:$0xff] %v2806_v0  ;;  %v2811_v1 = vld [vmem:[%s3834_s2 + $0x58] sm:$0xff]  ;;  %v2820_v2 = vld [vmem:[%s3834_s2 + $0x40] sm:$0xff] }
  0x24   :  { %433 = vmatpush1.msra.mxu0 %v2739_v53  ;;  %504 = vmatpush1.msra.mxu1 %v2744_v54  ;;  %3937 = vst [vmem:[#allocation20_spill] sm:$0xff] %v2811_v1  ;;  %3938 = vst [vmem:[#allocation21_spill] sm:$0xff] %v2820_v2  ;;  %v2825_v3 = vld [vmem:[%s3834_s2 + $0x50] sm:$0xff]  ;;  %v28_v4 = vld [vmem:[%s3832_s0 + $0x38] sm:$0xff] }
  0x25   :  { %434 = vmatprep.subr.mxu0 %v2751_v55  ;;  %505 = vmatprep.subr.mxu1 %v2756_v56  ;;  %3939 = vst [vmem:[#allocation22_spill] sm:$0xff] %v2825_v3  ;;  %v2837_v14 = vld [vmem:[%s3834_s2 + $0x28] sm:$0xff]  ;;  %v2842_v23 = vld [vmem:[%s3834_s2 + $0x38] sm:$0xff]  ;;  %v2849_v32 = vld [vmem:[%s3834_s2 + $0x20] sm:$0xff] }
  0x26   :  { %180 = vmatprep.mubr.f32.mxu0 %v3838_v5  ;;  %293 = vmatprep.mubr.f32.mxu1 %v3838_v5  ;;  %3940 = vst [vmem:[#allocation23_spill] sm:$0xff] %v2837_v14  ;;  %3941 = vst [vmem:[#allocation24_spill] sm:$0xff] %v2842_v23  ;;  %v2854_v41 = vld [vmem:[%s3834_s2 + $0x30] sm:$0xff]  ;;  %v2861_v50 = vld [vmem:[%s3834_s2 + $0x8] sm:$0xff] }
  0x27   :  { %435 = vmatpush1.msra.mxu0 %v2765_v57  ;;  %506 = vmatpush1.msra.mxu1 %v2770_v58  ;;  %3942 = vst [vmem:[#allocation25_spill] sm:$0xff] %v2849_v32  ;;  %3943 = vst [vmem:[#allocation26_spill] sm:$0xff] %v2854_v41 }
  0x28   :  { %2128 = vmatmul.mubr.msk.f32.gmra.mxu0 %vm55_vm0, %v27_v59  ;;  %2136 = vmatmul.mubr.msk.f32.gmra.mxu1 %vm55_vm0, %v27_v59  ;;  %3944 = vst [vmem:[#allocation27_spill] sm:$0xff] %v2861_v50  ;;  %v2866_v59 = vld [vmem:[%s3834_s2 + $0x18] sm:$0xff] }
  0x29   :  { %436 = vmatprep.subr.mxu0 %v2782_v60  ;;  %507 = vmatprep.subr.mxu1 %v2787_v61  ;;  %3945 = vst [vmem:[#allocation28_spill] sm:$0xff] %v2866_v59 }
  0x2a   :  { %437 = vmatpush1.msra.mxu0 %v2794_v62  ;;  %508 = vmatpush1.msra.mxu1 %v2799_v63 }
  0x2b   :  { %438 = vmatprep.subr.mxu0 %v2806_v0  ;;  %509 = vmatprep.subr.mxu1 %v2811_v1 }
  0x2c   :  { %186 = vmatprep.mubr.f32.mxu0 %v3838_v5  ;;  %299 = vmatprep.mubr.f32.mxu1 %v3838_v5  ;;  %v2873_v5 = vld [vmem:[%s3834_s2] sm:$0xff] }
  0x2d   :  { %439 = vmatpush1.msra.mxu0 %v2820_v2  ;;  %510 = vmatpush1.msra.mxu1 %v2825_v3  ;;  %3946 = vst [vmem:[#allocation29_spill] sm:$0xff] %v2873_v5 }
  0x2e   :  { %2129 = vmatmul.mubr.msk.f32.gmra.mxu0 %vm55_vm0, %v28_v4  ;;  %2137 = vmatmul.mubr.msk.f32.gmra.mxu1 %vm55_vm0, %v28_v4  ;;  %v2880_v4 = vld [vmem:[%s3834_s2 + $0x10] sm:$0xff] }
  0x2f   :  { %440 = vmatprep.subr.mxu0 %v2837_v14  ;;  %511 = vmatprep.subr.mxu1 %v2842_v23  ;;  %3947 = vst [vmem:[#allocation30_spill] sm:$0xff] %v2880_v4  ;;  %v3948_v23 = vmov 0.0  }
  0x30   :  { %441 = vmatpush1.msra.mxu0 %v2849_v32  ;;  %512 = vmatpush1.msra.mxu1 %v2854_v41 }
  0x31   :  { %442 = vmatprep.subr.mxu0 %v2861_v50  ;;  %513 = vmatprep.subr.mxu1 %v2866_v59 }
  0x32   :  { %443 = vmatpush1.msra.mxu0 %v2873_v5  ;;  %476 = vmatprep.mubr.f32.mxu0 %v3948_v23 }
  0x33   :  { %514 = vmatpush1.msra.mxu1 %v2880_v4  ;;  %547 = vmatprep.mubr.f32.mxu1 %v3948_v23 }
  0x34   :  { %477 = vmatmul.mubr.f32.vlgmr.msra.gmra.mxu0 %v3948_v23  ;;  %548 = vmatmul.mubr.f32.vlgmr.msra.gmra.mxu1 %v3948_v23 }
  0x35   :  { %594 = vmatprep.subr.mxu0 %v2453_v6  ;;  %665 = vmatprep.subr.mxu1 %v2458_v7 }
  0x36   :  { %595 = vmatpush1.msra.mxu0 %v2464_v8  ;;  %666 = vmatpush1.msra.mxu1 %v2469_v9 }
  0x37   :  { %596 = vmatprep.subr.mxu0 %v2476_v10  ;;  %667 = vmatprep.subr.mxu1 %v2481_v11 }
  0x38   :  { %597 = vmatpush1.msra.mxu0 %v2490_v12  ;;  %668 = vmatpush1.msra.mxu1 %v2495_v13 }
  0x39   :  { %598 = vmatprep.subr.mxu0 %v2507_v15  ;;  %669 = vmatprep.subr.mxu1 %v2512_v16 }
  0x3a   :  { %599 = vmatpush1.msra.mxu0 %v2519_v17  ;;  %670 = vmatpush1.msra.mxu1 %v2524_v18 }
  0x3b   :  { %600 = vmatprep.subr.mxu0 %v2531_v19  ;;  %671 = vmatprep.subr.mxu1 %v2536_v20 }
  0x3c   :  { %601 = vmatpush1.msra.mxu0 %v2545_v21  ;;  %672 = vmatpush1.msra.mxu1 %v2550_v22 }
  0x3d   :  { %602 = vmatprep.subr.mxu0 %v2562_v24  ;;  %673 = vmatprep.subr.mxu1 %v2567_v25 }
  0x3e   :  { %603 = vmatpush1.msra.mxu0 %v2574_v26  ;;  %674 = vmatpush1.msra.mxu1 %v2579_v27 }
  0x3f   :  { %604 = vmatprep.subr.mxu0 %v2586_v28  ;;  %675 = vmatprep.subr.mxu1 %v2591_v29 }
  0x40   :  { %605 = vmatpush1.msra.mxu0 %v2600_v30  ;;  %676 = vmatpush1.msra.mxu1 %v2605_v31 }
  0x41   :  { %606 = vmatprep.subr.mxu0 %v2617_v33  ;;  %677 = vmatprep.subr.mxu1 %v2622_v34 }
  0x42   :  { %607 = vmatpush1.msra.mxu0 %v2629_v35  ;;  %678 = vmatpush1.msra.mxu1 %v2634_v36 }
  0x43   :  { %608 = vmatprep.subr.mxu0 %v2641_v37  ;;  %679 = vmatprep.subr.mxu1 %v2646_v38 }
  0x44   :  { %609 = vmatpush1.msra.mxu0 %v2655_v39  ;;  %680 = vmatpush1.msra.mxu1 %v2660_v40 }
  0x45   :  { %610 = vmatprep.subr.mxu0 %v2672_v42  ;;  %681 = vmatprep.subr.mxu1 %v2677_v43 }
  0x46   :  { %611 = vmatpush1.msra.mxu0 %v2684_v44  ;;  %682 = vmatpush1.msra.mxu1 %v2689_v45 }
  0x47   :  { %612 = vmatprep.subr.mxu0 %v2696_v46  ;;  %683 = vmatprep.subr.mxu1 %v2701_v47 }
  0x48   :  { %613 = vmatpush1.msra.mxu0 %v2710_v48  ;;  %684 = vmatpush1.msra.mxu1 %v2715_v49 }
  0x49   :  { %614 = vmatprep.subr.mxu0 %v2727_v51  ;;  %685 = vmatprep.subr.mxu1 %v2732_v52 }
  0x4a   :  { %615 = vmatpush1.msra.mxu0 %v2739_v53  ;;  %686 = vmatpush1.msra.mxu1 %v2744_v54 }
  0x4b   :  { %616 = vmatprep.subr.mxu0 %v2751_v55  ;;  %687 = vmatprep.subr.mxu1 %v2756_v56 }
  0x4c   :  { %617 = vmatpush1.msra.mxu0 %v2765_v57  ;;  %688 = vmatpush1.msra.mxu1 %v2770_v58  ;;  %v3949_v57 = vld [vmem:[#allocation24_spill] sm:$0xff] }
  0x4d   :  { %618 = vmatprep.subr.mxu0 %v2782_v60  ;;  %689 = vmatprep.subr.mxu1 %v2787_v61 }
  0x4e   :  { %619 = vmatpush1.msra.mxu0 %v2794_v62  ;;  %690 = vmatpush1.msra.mxu1 %v2799_v63 }
  0x4f   :  { %620 = vmatprep.subr.mxu0 %v2806_v0  ;;  %691 = vmatprep.subr.mxu1 %v2811_v1 }
  0x50   :  { %621 = vmatpush1.msra.mxu0 %v2820_v2  ;;  %692 = vmatpush1.msra.mxu1 %v2825_v3 }
  0x51   :  { %622 = vmatprep.subr.mxu0 %v2837_v14  ;;  %693 = vmatprep.subr.mxu1 %v3949_v57  ;;  %v35_v57 = vlaneseq }
  0x52   :  { %623 = vmatpush1.msra.mxu0 %v2849_v32  ;;  %694 = vmatpush1.msra.mxu1 %v2854_v41 }
  0x53   :  { %624 = vmatprep.subr.mxu0 %v2861_v50  ;;  %695 = vmatprep.subr.mxu1 %v2866_v59  ;;  %v36_v32 = vshrl.u32 %v35_v57, 7 }
  0x54   :  { %625 = vmatpush1.msra.mxu0 %v2873_v5  ;;  %658 = vmatprep.mubr.f32.mxu0 %v3948_v23  ;;  %v33_v5 = vld [vmem:[%s3835_s3] sm:$0xf] }
  0x55   :  { %696 = vmatpush1.msra.mxu1 %v2880_v4  ;;  %729 = vmatprep.mubr.f32.mxu1 %v3948_v23  ;;  %v37_v50 = vsub.s32 0, %v36_v32  ;;  %v45_v59 = vsub.s32 2, %v36_v32  ;;  %v41_v23 = vsub.s32 1, %v36_v32 }
  0x56   :  { %777 = vmatprep.subr.mxu0 %v2453_v6  ;;  %848 = vmatprep.subr.mxu1 %v2458_v7  ;;  %v49_v6 = vsub.s32 3, %v36_v32 }
  0x57   :  { %v38_v2 = vrot.slane %v33_v5, %v37_v50  ;;  %v2969_v7 = vrot.slane %v33_v5, %v45_v59  ;;  %v42_v0 = vrot.slane %v33_v5, %v41_v23 }
  0x58   :  { %v2971_v63 = vrot.slane %v33_v5, %v49_v6 }
  0xc4   :  { %v2958_v14 = vpop.f32.mrf.mxu0  ;;  %v2960_v41 = vpop.f32.mrf.mxu1 }
  0xc6   :  { %v2965_v3 = vpop.f32.mrf.mxu0  ;;  %v2967_v4 = vpop.f32.mrf.mxu1 }
  0xca   :  { %v152_v57 = vpop.f32.mrf.mxu0  ;;  %v265_v1 = vpop.f32.mrf.mxu1 }
  0xcb   :  { %v2973_v62 = vadd.f32 %v152_v57, %v38_v2  ;;  %v2976_v61 = vadd.f32 %v265_v1, %v2969_v7 }
  0xcc   :  { %v154_v60 = vpop.f32.mrf.mxu0  ;;  %v267_v58 = vpop.f32.mrf.mxu1 }
  0xcd   :  { %3950 = vst [vmem:[#allocation31_spill] sm:$0xff] %v2973_v62  ;;  %3951 = vst [vmem:[#allocation32_spill] sm:$0xff] %v2976_v61  ;;  %v2978_v56 = vadd.f32 %v154_v60, %v42_v0  ;;  %v2981_v55 = vadd.f32 %v267_v58, %v2971_v63 }
  0xcf   :  { %3952 = vst [vmem:[#allocation33_spill] sm:$0xff] %v2978_v56  ;;  %3953 = vst [vmem:[#allocation34_spill] sm:$0xff] %v2981_v55 }
  0xd0   :  { %v158_v32 = vpop.f32.mrf.mxu0  ;;  %v271_v50 = vpop.f32.mrf.mxu1 }
  0xd1   :  { %v2983_v59 = vadd.f32 %v158_v32, %v38_v2  ;;  %v2986_v23 = vadd.f32 %v271_v50, %v2969_v7 }
  0xd2   :  { %v160_v5 = vpop.f32.mrf.mxu0  ;;  %v273_v6 = vpop.f32.mrf.mxu1 }
  0xd3   :  { %3954 = vst [vmem:[#allocation35_spill] sm:$0xff] %v2983_v59  ;;  %3955 = vst [vmem:[#allocation36_spill] sm:$0xff] %v2986_v23  ;;  %v2988_v57 = vadd.f32 %v160_v5, %v42_v0  ;;  %v2991_v1 = vadd.f32 %v273_v6, %v2971_v63 }
  0xd5   :  { %3956 = vst [vmem:[#allocation37_spill] sm:$0xff] %v2988_v57  ;;  %3957 = vst [vmem:[#allocation38_spill] sm:$0xff] %v2991_v1 }
  0xd6   :  { %v164_v61 = vpop.f32.mrf.mxu0  ;;  %v277_v60 = vpop.f32.mrf.mxu1 }
  0xd7   :  { %v2993_v56 = vadd.f32 %v164_v61, %v38_v2  ;;  %v2996_v58 = vadd.f32 %v277_v60, %v2969_v7 }
  0xd8   :  { %v166_v55 = vpop.f32.mrf.mxu0  ;;  %v279_v32 = vpop.f32.mrf.mxu1 }
  0xd9   :  { %3958 = vst [vmem:[#allocation39_spill] sm:$0xff] %v2993_v56  ;;  %3959 = vst [vmem:[#allocation40_spill] sm:$0xff] %v2996_v58  ;;  %v2998_v59 = vadd.f32 %v166_v55, %v42_v0  ;;  %v3001_v50 = vadd.f32 %v279_v32, %v2971_v63 }
  0xdb   :  { %3960 = vst [vmem:[#allocation41_spill] sm:$0xff] %v2998_v59  ;;  %3961 = vst [vmem:[#allocation42_spill] sm:$0xff] %v3001_v50 }
  0xdc   :  { %v170_v23 = vpop.f32.mrf.mxu0  ;;  %v283_v5 = vpop.f32.mrf.mxu1 }
  0xdd   :  { %v3003_v57 = vadd.f32 %v170_v23, %v38_v2  ;;  %v3006_v6 = vadd.f32 %v283_v5, %v2969_v7 }
  0xde   :  { %v172_v1 = vpop.f32.mrf.mxu0  ;;  %v285_v61 = vpop.f32.mrf.mxu1 }
  0xdf   :  { %3962 = vst [vmem:[#allocation43_spill] sm:$0xff] %v3003_v57  ;;  %3963 = vst [vmem:[#allocation44_spill] sm:$0xff] %v3006_v6  ;;  %v3008_v56 = vadd.f32 %v172_v1, %v42_v0  ;;  %v3011_v60 = vadd.f32 %v285_v61, %v2971_v63 }
  0xe1   :  { %3964 = vst [vmem:[#allocation45_spill] sm:$0xff] %v3008_v56  ;;  %3965 = vst [vmem:[#allocation46_spill] sm:$0xff] %v3011_v60 }
  0xe2   :  { %v176_v58 = vpop.f32.mrf.mxu0  ;;  %v289_v55 = vpop.f32.mrf.mxu1 }
  0xe3   :  { %v3013_v59 = vadd.f32 %v176_v58, %v38_v2  ;;  %v3016_v32 = vadd.f32 %v289_v55, %v2969_v7 }
  0xe4   :  { %v178_v50 = vpop.f32.mrf.mxu0  ;;  %v291_v23 = vpop.f32.mrf.mxu1 }
  0xe5   :  { %3966 = vst [vmem:[#allocation47_spill] sm:$0xff] %v3013_v59  ;;  %3967 = vst [vmem:[#allocation48_spill] sm:$0xff] %v3016_v32  ;;  %v3018_v57 = vadd.f32 %v178_v50, %v42_v0  ;;  %v3021_v5 = vadd.f32 %v291_v23, %v2971_v63 }
  0xe7   :  { %3968 = vst [vmem:[#allocation49_spill] sm:$0xff] %v3018_v57  ;;  %3969 = vst [vmem:[#allocation50_spill] sm:$0xff] %v3021_v5 }
  0xe8   :  { %v182_v6 = vpop.f32.mrf.mxu0  ;;  %v295_v1 = vpop.f32.mrf.mxu1 }
  0xe9   :  { %v3023_v56 = vadd.f32 %v182_v6, %v38_v2  ;;  %v3026_v61 = vadd.f32 %v295_v1, %v2969_v7 }
  0xea   :  { %v184_v60 = vpop.f32.mrf.mxu0  ;;  %v297_v58 = vpop.f32.mrf.mxu1 }
  0xeb   :  { %3970 = vst [vmem:[#allocation51_spill] sm:$0xff] %v3023_v56  ;;  %3971 = vst [vmem:[#allocation52_spill] sm:$0xff] %v3026_v61  ;;  %v3028_v59 = vadd.f32 %v184_v60, %v42_v0  ;;  %v3031_v55 = vadd.f32 %v297_v58, %v2971_v63  ;;  %v147_v60 = vadd.f32 %v2958_v14, %v38_v2 }
  0xec   :  { %v149_v58 = vadd.f32 %v2965_v3, %v42_v0 }
  0xed   :  { %3972 = vst [vmem:[#allocation53_spill] sm:$0xff] %v3028_v59  ;;  %3973 = vst [vmem:[#allocation54_spill] sm:$0xff] %v3031_v55 }
  0xee   :  { %v188_v32 = vpop.f32.mrf.mxu0  ;;  %v301_v50 = vpop.f32.mrf.mxu1 }
  0xef   :  { %v3033_v57 = vadd.f32 %v188_v32, %v38_v2  ;;  %v3036_v23 = vadd.f32 %v301_v50, %v2969_v7 }
  0xf0   :  { %v190_v5 = vpop.f32.mrf.mxu0  ;;  %v303_v6 = vpop.f32.mrf.mxu1 }
  0xf1   :  { %3974 = vst [vmem:[#allocation55_spill] sm:$0xff] %v3033_v57  ;;  %3975 = vst [vmem:[#allocation56_spill] sm:$0xff] %v3036_v23  ;;  %v3038_v56 = vadd.f32 %v190_v5, %v42_v0  ;;  %v3041_v1 = vadd.f32 %v303_v6, %v2971_v63  ;;  %v262_v5 = vadd.f32 %v2967_v4, %v2971_v63 }
  0xf2   :  { %v260_v6 = vadd.f32 %v2960_v41, %v2969_v7 }
  0xf3   :  { %3976 = vst [vmem:[#allocation57_spill] sm:$0xff] %v3038_v56  ;;  %3977 = vst [vmem:[#allocation58_spill] sm:$0xff] %v3041_v1 }
  0xf4   :  { %v478_v61 = vpop.f32.mrf.mxu0  ;;  %v549_v57 = vpop.f32.mrf.mxu1 }
  0xf5   :  { %v554_v55 = vadd.f32 %v478_v61, %v147_v60  ;;  %v556_v1 = vadd.f32 %v549_v57, %v260_v6  ;;  %v3978_v57 = vld [vmem:[#allocation11_spill] sm:$0xff]  ;;  %v3983_v6 = vld [vmem:[#allocation16_spill] sm:$0xff] }
  0xf6   :  { %v480_v59 = vpop.f32.mrf.mxu0  ;;  %v551_v23 = vpop.f32.mrf.mxu1 }
  0xf7   :  { %v2138_v62 = vmul.f32 -1.442695, %v554_v55  ;;  %v555_v32 = vadd.f32 %v480_v59, %v149_v58  ;;  %v557_v56 = vadd.f32 %v551_v23, %v262_v5  ;;  %v3982_v5 = vld [vmem:[#allocation15_spill] sm:$0xff] }
  0xf9   :  { %2186 = vpow2.f32 %v2138_v62  ;;  %v2139_v50 = vmul.f32 -1.442695, %v555_v32  ;;  %v2140_v2 = vmul.f32 -1.442695, %v557_v56  ;;  %v3980_v32 = vld [vmem:[#allocation13_spill] sm:$0xff] }
  0xfb   :  { %2188 = vpow2.f32 %v2139_v50  ;;  %v3981_v50 = vld [vmem:[#allocation14_spill] sm:$0xff] }
  0xfc   :  { %2190 = vpow2.f32 %v2140_v2  ;;  %v3984_v2 = vld [vmem:[#allocation17_spill] sm:$0xff] }
 0x106   :  { %v2187_v14 = vpop.eup %2186 }
 0x107   :  { %v561_v0 = vadd.f32 1.0, %v2187_v14  ;;  %v3985_v14 = vld [vmem:[#allocation18_spill] sm:$0xff] }
 0x108   :  { %v2189_v3 = vpop.eup %2188 }
 0x109   :  { %2192 = vrcp.f32 %v561_v0  ;;  %v567_v59 = vadd.f32 1.0, %v2189_v3  ;;  %v2191_v62 = vpop.eup %2190  ;;  %v3986_v0 = vld [vmem:[#allocation19_spill] sm:$0xff]  ;;  %v3987_v3 = vld [vmem:[#allocation20_spill] sm:$0xff] }
 0x10a   :  { %2194 = vtanh.f32 %v556_v1  ;;  %v574_v58 = vadd.f32 1.0, %v2191_v62  ;;  %v3979_v1 = vld [vmem:[#allocation12_spill] sm:$0xff]  ;;  %v3989_v62 = vld [vmem:[#allocation22_spill] sm:$0xff] }
 0x10b   :  { %2196 = vrcp.f32 %v567_v59  ;;  %v3988_v59 = vld [vmem:[#allocation21_spill] sm:$0xff] }
 0x10c   :  { %2198 = vrcp.f32 %v574_v58  ;;  %v3993_v58 = vld [vmem:[#allocation26_spill] sm:$0xff] }
 0x116   :  { %v2193_v61 = vpop.eup %2192 }
 0x117   :  { %v2195_v55 = vpop.eup %2194 }
 0x118   :  { %v2197_v60 = vpop.eup %2196  ;;  %v579_v4 = vmul.f32 %v2195_v55, %v2193_v61  ;;  %v3990_v61 = vld [vmem:[#allocation23_spill] sm:$0xff]  ;;  %v3991_v55 = vld [vmem:[#allocation24_spill] sm:$0xff] }
 0x119   :  { %v578_v63 = vmul.f32 0.0, %v2197_v60  ;;  %v2199_v7 = vpop.eup %2198  ;;  %v3992_v60 = vld [vmem:[#allocation25_spill] sm:$0xff] }
 0x11b   :  { %v3049_v23 = vadd.f32 %v579_v4, %v578_v63  ;;  %v3994_v63 = vld [vmem:[#allocation27_spill] sm:$0xff]  ;;  %v3995_v4 = vld [vmem:[#allocation28_spill] sm:$0xff] }
 0x11d   :  { %2200 = vtanh.f32 %v3049_v23 }
 0x12a   :  { %v2201_v56 = vpop.eup %2200 }
 0x12b   :  { %v582_v41 = vmul.f32 %v2201_v56, %v2199_v7  ;;  %v3996_v7 = vld [vmem:[#allocation29_spill] sm:$0xff]  ;;  %v3997_v56 = vmov 0.0  }
 0x12d   :  { %585 = vst [vmem:[#allocation5] sm:$0xff] %v582_v41  ;;  %659 = vmatmul.mubr.f32.vlgmr.msra.gmra.mxu0 %v582_v41  ;;  %730 = vmatmul.mubr.f32.vlgmr.msra.gmra.mxu1 %v582_v41  ;;  %v3998_v41 = vld [vmem:[#allocation30_spill] sm:$0xff] }
 0x12e   :  { %778 = vmatpush1.msra.mxu0 %v2464_v8  ;;  %849 = vmatpush1.msra.mxu1 %v2469_v9 }
 0x12f   :  { %779 = vmatprep.subr.mxu0 %v2476_v10  ;;  %850 = vmatprep.subr.mxu1 %v2481_v11 }
 0x130   :  { %780 = vmatpush1.msra.mxu0 %v2490_v12  ;;  %851 = vmatpush1.msra.mxu1 %v2495_v13 }
 0x131   :  { %781 = vmatprep.subr.mxu0 %v2507_v15  ;;  %852 = vmatprep.subr.mxu1 %v2512_v16 }
 0x132   :  { %782 = vmatpush1.msra.mxu0 %v2519_v17  ;;  %853 = vmatpush1.msra.mxu1 %v2524_v18 }
 0x133   :  { %783 = vmatprep.subr.mxu0 %v2531_v19  ;;  %854 = vmatprep.subr.mxu1 %v2536_v20 }
 0x134   :  { %784 = vmatpush1.msra.mxu0 %v2545_v21  ;;  %855 = vmatpush1.msra.mxu1 %v2550_v22 }
 0x135   :  { %785 = vmatprep.subr.mxu0 %v2562_v24  ;;  %856 = vmatprep.subr.mxu1 %v2567_v25 }
 0x136   :  { %786 = vmatpush1.msra.mxu0 %v2574_v26  ;;  %857 = vmatpush1.msra.mxu1 %v2579_v27 }
 0x137   :  { %787 = vmatprep.subr.mxu0 %v2586_v28  ;;  %858 = vmatprep.subr.mxu1 %v2591_v29 }
 0x138   :  { %788 = vmatpush1.msra.mxu0 %v2600_v30  ;;  %859 = vmatpush1.msra.mxu1 %v2605_v31 }
 0x139   :  { %789 = vmatprep.subr.mxu0 %v2617_v33  ;;  %860 = vmatprep.subr.mxu1 %v2622_v34 }
 0x13a   :  { %790 = vmatpush1.msra.mxu0 %v2629_v35  ;;  %861 = vmatpush1.msra.mxu1 %v2634_v36 }
 0x13b   :  { %791 = vmatprep.subr.mxu0 %v2641_v37  ;;  %862 = vmatprep.subr.mxu1 %v2646_v38 }
 0x13c   :  { %792 = vmatpush1.msra.mxu0 %v2655_v39  ;;  %863 = vmatpush1.msra.mxu1 %v2660_v40 }
 0x13d   :  { %793 = vmatprep.subr.mxu0 %v2672_v42  ;;  %864 = vmatprep.subr.mxu1 %v2677_v43 }
 0x13e   :  { %794 = vmatpush1.msra.mxu0 %v2684_v44  ;;  %865 = vmatpush1.msra.mxu1 %v2689_v45 }
 0x13f   :  { %795 = vmatprep.subr.mxu0 %v2696_v46  ;;  %866 = vmatprep.subr.mxu1 %v2701_v47 }
 0x140   :  { %796 = vmatpush1.msra.mxu0 %v2710_v48  ;;  %867 = vmatpush1.msra.mxu1 %v2715_v49 }
 0x141   :  { %797 = vmatprep.subr.mxu0 %v2727_v51  ;;  %868 = vmatprep.subr.mxu1 %v2732_v52 }
 0x142   :  { %798 = vmatpush1.msra.mxu0 %v2739_v53  ;;  %869 = vmatpush1.msra.mxu1 %v2744_v54 }
 0x143   :  { %799 = vmatprep.subr.mxu0 %v3978_v57  ;;  %870 = vmatprep.subr.mxu1 %v3979_v1 }
 0x144   :  { %800 = vmatpush1.msra.mxu0 %v3980_v32  ;;  %871 = vmatpush1.msra.mxu1 %v3981_v50 }
 0x145   :  { %801 = vmatprep.subr.mxu0 %v3982_v5  ;;  %872 = vmatprep.subr.mxu1 %v3983_v6  ;;  %v4004_v6 = vld [vmem:[#allocation32_spill] sm:$0xff] }
 0x146   :  { %802 = vmatpush1.msra.mxu0 %v3984_v2  ;;  %873 = vmatpush1.msra.mxu1 %v3985_v14  ;;  %v4003_v2 = vld [vmem:[#allocation34_spill] sm:$0xff] }
 0x147   :  { %803 = vmatprep.subr.mxu0 %v3986_v0  ;;  %874 = vmatprep.subr.mxu1 %v3987_v3 }
 0x148   :  { %804 = vmatpush1.msra.mxu0 %v3988_v59  ;;  %875 = vmatpush1.msra.mxu1 %v3989_v62  ;;  %v3999_v62 = vld [vmem:[#allocation9_spill] sm:$0xff] }
 0x149   :  { %805 = vmatprep.subr.mxu0 %v3990_v61  ;;  %876 = vmatprep.subr.mxu1 %v3991_v55  ;;  %v4000_v61 = vld [vmem:[#allocation10_spill] sm:$0xff] }
 0x14a   :  { %806 = vmatpush1.msra.mxu0 %v3992_v60  ;;  %877 = vmatpush1.msra.mxu1 %v3993_v58  ;;  %v4001_v60 = vld [vmem:[#allocation31_spill] sm:$0xff] }
 0x14b   :  { %807 = vmatprep.subr.mxu0 %v3994_v63  ;;  %878 = vmatprep.subr.mxu1 %v3995_v4  ;;  %v4002_v63 = vld [vmem:[#allocation33_spill] sm:$0xff] }
 0x14c   :  { %808 = vmatpush1.msra.mxu0 %v3996_v7  ;;  %841 = vmatprep.mubr.f32.mxu0 %v3997_v56 }
 0x14d   :  { %879 = vmatpush1.msra.mxu1 %v3998_v41  ;;  %912 = vmatprep.mubr.f32.mxu1 %v3997_v56 }
 0x14e   :  { %960 = vmatprep.subr.mxu0 %v3999_v62  ;;  %1031 = vmatprep.subr.mxu1 %v4000_v61 }
 0x1ed   :  { %v660_v55 = vpop.f32.mrf.mxu0  ;;  %v731_v4 = vpop.f32.mrf.mxu1 }
 0x1ee   :  { %v736_v59 = vadd.f32 %v660_v55, %v4001_v60  ;;  %v738_v56 = vadd.f32 %v731_v4, %v4004_v6 }
 0x1ef   :  { %v662_v58 = vpop.f32.mrf.mxu0  ;;  %v733_v14 = vpop.f32.mrf.mxu1 }
 0x1f0   :  { %v2141_v3 = vmul.f32 -1.442695, %v736_v59  ;;  %v737_v0 = vadd.f32 %v662_v58, %v4002_v63  ;;  %v739_v41 = vadd.f32 %v733_v14, %v4003_v2 }
 0x1f2   :  { %2202 = vpow2.f32 %v2141_v3  ;;  %v2142_v7 = vmul.f32 -1.442695, %v737_v0  ;;  %v2143_v5 = vmul.f32 -1.442695, %v739_v41  ;;  %v4028_v41 = vld [vmem:[#allocation36_spill] sm:$0xff] }
 0x1f4   :  { %2204 = vpow2.f32 %v2142_v7 }
 0x1f5   :  { %2206 = vtanh.f32 %v738_v56 }
 0x1f6   :  { %2208 = vpow2.f32 %v2143_v5  ;;  %v4027_v5 = vld [vmem:[#allocation38_spill] sm:$0xff] }
 0x1ff   :  { %v2203_v62 = vpop.eup %2202 }
 0x200   :  { %v743_v50 = vadd.f32 1.0, %v2203_v62 }
 0x201   :  { %v2205_v61 = vpop.eup %2204 }
 0x202   :  { %2210 = vrcp.f32 %v743_v50  ;;  %v749_v55 = vadd.f32 1.0, %v2205_v61  ;;  %v2207_v59 = vpop.eup %2206 }
 0x203   :  { %v2209_v60 = vpop.eup %2208 }
 0x204   :  { %2212 = vrcp.f32 %v749_v55  ;;  %v756_v63 = vadd.f32 1.0, %v2209_v60 }
 0x206   :  { %2214 = vrcp.f32 %v756_v63 }
 0x20f   :  { %v2211_v3 = vpop.eup %2210 }
 0x210   :  { %v761_v58 = vmul.f32 %v2211_v3, %v2207_v59 }
 0x211   :  { %v2213_v0 = vpop.eup %2212 }
 0x212   :  { %v760_v7 = vmul.f32 %v2213_v0, %v3049_v23 }
 0x213   :  { %v2215_v6 = vpop.eup %2214 }
 0x214   :  { %v3123_v2 = vadd.f32 %v761_v58, %v760_v7 }
 0x216   :  { %2216 = vtanh.f32 %v3123_v2 }
 0x223   :  { %v2217_v14 = vpop.eup %2216 }
 0x224   :  { %v764_v4 = vmul.f32 %v2217_v14, %v2215_v6 }
 0x226   :  { %768 = vst [vmem:[#allocation5 + $0x8] sm:$0xff] %v764_v4  ;;  %842 = vmatmul.mubr.f32.vlgmr.msra.gmra.mxu0 %v764_v4  ;;  %913 = vmatmul.mubr.f32.vlgmr.msra.gmra.mxu1 %v764_v4 }
 0x227   :  { %961 = vmatpush1.msra.mxu0 %v2464_v8  ;;  %1032 = vmatpush1.msra.mxu1 %v2469_v9  ;;  %v4005_v8 = vld [vmem:[#allocation14_spill] sm:$0xff]  ;;  %v4006_v9 = vld [vmem:[#allocation15_spill] sm:$0xff] }
 0x228   :  { %962 = vmatprep.subr.mxu0 %v2476_v10  ;;  %1033 = vmatprep.subr.mxu1 %v2481_v11  ;;  %v4007_v10 = vld [vmem:[#allocation16_spill] sm:$0xff]  ;;  %v4008_v11 = vld [vmem:[#allocation17_spill] sm:$0xff] }
 0x229   :  { %963 = vmatpush1.msra.mxu0 %v2490_v12  ;;  %1034 = vmatpush1.msra.mxu1 %v2495_v13  ;;  %v4009_v12 = vld [vmem:[#allocation18_spill] sm:$0xff]  ;;  %v4010_v13 = vld [vmem:[#allocation19_spill] sm:$0xff] }
 0x22a   :  { %964 = vmatprep.subr.mxu0 %v2507_v15  ;;  %1035 = vmatprep.subr.mxu1 %v2512_v16  ;;  %v4011_v15 = vld [vmem:[#allocation20_spill] sm:$0xff]  ;;  %v4012_v16 = vld [vmem:[#allocation21_spill] sm:$0xff] }
 0x22b   :  { %965 = vmatpush1.msra.mxu0 %v2519_v17  ;;  %1036 = vmatpush1.msra.mxu1 %v2524_v18  ;;  %v4013_v17 = vld [vmem:[#allocation22_spill] sm:$0xff]  ;;  %v4014_v18 = vld [vmem:[#allocation23_spill] sm:$0xff] }
 0x22c   :  { %966 = vmatprep.subr.mxu0 %v2531_v19  ;;  %1037 = vmatprep.subr.mxu1 %v2536_v20  ;;  %v4015_v19 = vld [vmem:[#allocation24_spill] sm:$0xff]  ;;  %v4016_v20 = vld [vmem:[#allocation25_spill] sm:$0xff] }
 0x22d   :  { %967 = vmatpush1.msra.mxu0 %v2545_v21  ;;  %1038 = vmatpush1.msra.mxu1 %v2550_v22  ;;  %v4017_v21 = vld [vmem:[#allocation26_spill] sm:$0xff]  ;;  %v4018_v22 = vld [vmem:[#allocation27_spill] sm:$0xff] }
 0x22e   :  { %968 = vmatprep.subr.mxu0 %v2562_v24  ;;  %1039 = vmatprep.subr.mxu1 %v2567_v25  ;;  %v4019_v24 = vld [vmem:[#allocation28_spill] sm:$0xff]  ;;  %v4020_v25 = vld [vmem:[#allocation29_spill] sm:$0xff] }
 0x22f   :  { %969 = vmatpush1.msra.mxu0 %v2574_v26  ;;  %1040 = vmatpush1.msra.mxu1 %v2579_v27  ;;  %v4021_v26 = vmov 0.0   ;;  %v4022_v27 = vld [vmem:[#allocation30_spill] sm:$0xff] }
 0x230   :  { %970 = vmatprep.subr.mxu0 %v2586_v28  ;;  %1041 = vmatprep.subr.mxu1 %v2591_v29  ;;  %v3193_v28 = vld [vmem:[%s3834_s2 + $0x1e8] sm:$0xff]  ;;  %v3199_v29 = vld [vmem:[%s3834_s2 + $0x1f8] sm:$0xff] }
 0x231   :  { %971 = vmatpush1.msra.mxu0 %v2600_v30  ;;  %1042 = vmatpush1.msra.mxu1 %v2605_v31  ;;  %4023 = vst [vmem:[#allocation11_spill] sm:$0xff] %v3193_v28  ;;  %4024 = vst [vmem:[#allocation12_spill] sm:$0xff] %v3199_v29  ;;  %v4025_v31 = vld [vmem:[#allocation35_spill] sm:$0xff] }
 0x232   :  { %972 = vmatprep.subr.mxu0 %v2617_v33  ;;  %1043 = vmatprep.subr.mxu1 %v2622_v34 }
 0x233   :  { %973 = vmatpush1.msra.mxu0 %v2629_v35  ;;  %1044 = vmatpush1.msra.mxu1 %v2634_v36  ;;  %v4026_v36 = vld [vmem:[#allocation37_spill] sm:$0xff] }
 0x234   :  { %974 = vmatprep.subr.mxu0 %v2641_v37  ;;  %1045 = vmatprep.subr.mxu1 %v2646_v38 }
 0x235   :  { %975 = vmatpush1.msra.mxu0 %v2655_v39  ;;  %1046 = vmatpush1.msra.mxu1 %v2660_v40 }
 0x236   :  { %976 = vmatprep.subr.mxu0 %v2672_v42  ;;  %1047 = vmatprep.subr.mxu1 %v2677_v43 }
 0x237   :  { %977 = vmatpush1.msra.mxu0 %v2684_v44  ;;  %1048 = vmatpush1.msra.mxu1 %v2689_v45 }
 0x238   :  { %978 = vmatprep.subr.mxu0 %v2696_v46  ;;  %1049 = vmatprep.subr.mxu1 %v2701_v47 }
 0x239   :  { %979 = vmatpush1.msra.mxu0 %v2710_v48  ;;  %1050 = vmatpush1.msra.mxu1 %v2715_v49 }
 0x23a   :  { %980 = vmatprep.subr.mxu0 %v2727_v51  ;;  %1051 = vmatprep.subr.mxu1 %v2732_v52 }
 0x23b   :  { %981 = vmatpush1.msra.mxu0 %v2739_v53  ;;  %1052 = vmatpush1.msra.mxu1 %v2744_v54 }
 0x23c   :  { %982 = vmatprep.subr.mxu0 %v3978_v57  ;;  %1053 = vmatprep.subr.mxu1 %v3979_v1 }
 0x23d   :  { %983 = vmatpush1.msra.mxu0 %v3980_v32  ;;  %1054 = vmatpush1.msra.mxu1 %v4005_v8 }
 0x23e   :  { %984 = vmatprep.subr.mxu0 %v4006_v9  ;;  %1055 = vmatprep.subr.mxu1 %v4007_v10 }
 0x23f   :  { %985 = vmatpush1.msra.mxu0 %v4008_v11  ;;  %1056 = vmatpush1.msra.mxu1 %v4009_v12 }
 0x240   :  { %986 = vmatprep.subr.mxu0 %v4010_v13  ;;  %1057 = vmatprep.subr.mxu1 %v4011_v15 }
 0x241   :  { %987 = vmatpush1.msra.mxu0 %v4012_v16  ;;  %1058 = vmatpush1.msra.mxu1 %v4013_v17 }
 0x242   :  { %988 = vmatprep.subr.mxu0 %v4014_v18  ;;  %1059 = vmatprep.subr.mxu1 %v4015_v19 }
 0x243   :  { %989 = vmatpush1.msra.mxu0 %v4016_v20  ;;  %1060 = vmatpush1.msra.mxu1 %v4017_v21 }
 0x244   :  { %990 = vmatprep.subr.mxu0 %v4018_v22  ;;  %1061 = vmatprep.subr.mxu1 %v4019_v24 }
 0x245   :  { %991 = vmatpush1.msra.mxu0 %v4020_v25  ;;  %1024 = vmatprep.mubr.f32.mxu0 %v4021_v26 }
 0x246   :  { %1062 = vmatpush1.msra.mxu1 %v4022_v27  ;;  %1095 = vmatprep.mubr.f32.mxu1 %v4021_v26 }
 0x247   :  { %1143 = vmatprep.subr.mxu0 %v3193_v28  ;;  %1214 = vmatprep.subr.mxu1 %v3199_v29 }
 0x2e6   :  { %v843_v30 = vpop.f32.mrf.mxu0  ;;  %v914_v38 = vpop.f32.mrf.mxu1 }
 0x2e7   :  { %v919_v33 = vadd.f32 %v843_v30, %v4025_v31  ;;  %v921_v62 = vadd.f32 %v914_v38, %v4028_v41  ;;  %v3237_v38 = vld [vmem:[%s3834_s2 + $0x1c0] sm:$0xff]  ;;  %v3267_v41 = vld [vmem:[%s3834_s2 + $0x1b0] sm:$0xff] }
 0x2e8   :  { %v845_v34 = vpop.f32.mrf.mxu0  ;;  %v916_v50 = vpop.f32.mrf.mxu1 }
 0x2e9   :  { %v2144_v35 = vmul.f32 -1.442695, %v919_v33  ;;  %v920_v37 = vadd.f32 %v845_v34, %v4026_v36  ;;  %v922_v56 = vadd.f32 %v916_v50, %v4027_v5  ;;  %v3225_v36 = vld [vmem:[%s3834_s2 + $0x1c8] sm:$0xff]  ;;  %v3255_v5 = vld [vmem:[%s3834_s2 + $0x1b8] sm:$0xff] }
 0x2ea   :  { %v3249_v50 = vld [vmem:[%s3834_s2 + $0x1a8] sm:$0xff] }
 0x2eb   :  { %2218 = vpow2.f32 %v2144_v35  ;;  %v2145_v23 = vmul.f32 -1.442695, %v920_v37  ;;  %v2146_v61 = vmul.f32 -1.442695, %v922_v56  ;;  %v3213_v35 = vld [vmem:[%s3834_s2 + $0x1e0] sm:$0xff]  ;;  %v3231_v37 = vld [vmem:[%s3834_s2 + $0x1d8] sm:$0xff] }
 0x2ec   :  { %v3261_v56 = vld [vmem:[%s3834_s2 + $0x1a0] sm:$0xff] }
 0x2ed   :  { %2220 = vpow2.f32 %v2145_v23  ;;  %v3243_v23 = vld [vmem:[%s3834_s2 + $0x1d0] sm:$0xff] }
 0x2ee   :  { %2222 = vtanh.f32 %v921_v62  ;;  %v3273_v62 = vld [vmem:[%s3834_s2 + $0x188] sm:$0xff] }
 0x2ef   :  { %2224 = vpow2.f32 %v2146_v61  ;;  %v3279_v61 = vld [vmem:[%s3834_s2 + $0x198] sm:$0xff] }
 0x2f8   :  { %v2219_v55 = vpop.eup %2218 }
 0x2f9   :  { %v926_v59 = vadd.f32 1.0, %v2219_v55  ;;  %v3285_v55 = vld [vmem:[%s3834_s2 + $0x180] sm:$0xff] }
 0x2fa   :  { %v2221_v60 = vpop.eup %2220 }
 0x2fb   :  { %2226 = vrcp.f32 %v926_v59  ;;  %v932_v3 = vadd.f32 1.0, %v2221_v60  ;;  %v2223_v58 = vpop.eup %2222  ;;  %v3291_v59 = vld [vmem:[%s3834_s2 + $0x190] sm:$0xff]  ;;  %v3297_v60 = vld [vmem:[%s3834_s2 + $0x168] sm:$0xff] }
 0x2fc   :  { %v2225_v0 = vpop.eup %2224 }
 0x2fd   :  { %2228 = vrcp.f32 %v932_v3  ;;  %v939_v14 = vadd.f32 1.0, %v2225_v0  ;;  %v3303_v3 = vld [vmem:[%s3834_s2 + $0x178] sm:$0xff]  ;;  %v3315_v0 = vld [vmem:[%s3834_s2 + $0x170] sm:$0xff] }
 0x2ff   :  { %2230 = vrcp.f32 %v939_v14  ;;  %v3339_v14 = vld [vmem:[%s3834_s2 + $0x150] sm:$0xff] }
 0x308   :  { %v2227_v63 = vpop.eup %2226 }
 0x309   :  { %v944_v7 = vmul.f32 %v2227_v63, %v2223_v58  ;;  %v3309_v58 = vld [vmem:[%s3834_s2 + $0x160] sm:$0xff]  ;;  %v3321_v63 = vld [vmem:[%s3834_s2 + $0x148] sm:$0xff] }
 0x30a   :  { %v2229_v6 = vpop.eup %2228 }
 0x30b   :  { %v943_v4 = vmul.f32 %v2229_v6, %v3123_v2  ;;  %v3219_v2 = vld [vmem:[%s3834_s2 + $0x1f0] sm:$0xff]  ;;  %v3333_v6 = vld [vmem:[%s3834_s2 + $0x140] sm:$0xff] }
 0x30c   :  { %v2231_v31 = vpop.eup %2230 }
 0x30d   :  { %v3207_v30 = vadd.f32 %v944_v7, %v943_v4  ;;  %v3327_v7 = vld [vmem:[%s3834_s2 + $0x158] sm:$0xff]  ;;  %v3345_v4 = vld [vmem:[%s3834_s2 + $0x128] sm:$0xff] }
 0x30e   :  { %4029 = vst [vmem:[#allocation13_spill] sm:$0xff] %v3345_v4 }
 0x30f   :  { %2232 = vtanh.f32 %v3207_v30 }
 0x31c   :  { %v2233_v33 = vpop.eup %2232 }
 0x31d   :  { %v947_v34 = vmul.f32 %v2233_v33, %v2231_v31  ;;  %v3351_v31 = vld [vmem:[%s3834_s2 + $0x138] sm:$0xff]  ;;  %v3357_v33 = vld [vmem:[%s3834_s2 + $0x120] sm:$0xff] }
 0x31e   :  { %4030 = vst [vmem:[#allocation9_spill] sm:$0xff] %v3351_v31 }
 0x31f   :  { %951 = vst [vmem:[#allocation5 + $0x10] sm:$0xff] %v947_v34  ;;  %1025 = vmatmul.mubr.f32.vlgmr.msra.gmra.mxu0 %v947_v34  ;;  %1096 = vmatmul.mubr.f32.vlgmr.msra.gmra.mxu1 %v947_v34  ;;  %v3363_v34 = vld [vmem:[%s3834_s2 + $0x130] sm:$0xff] }
 0x320   :  { %1144 = vmatpush1.msra.mxu0 %v3213_v35  ;;  %1215 = vmatpush1.msra.mxu1 %v3219_v2 }
 0x321   :  { %1145 = vmatprep.subr.mxu0 %v3225_v36  ;;  %1216 = vmatprep.subr.mxu1 %v3231_v37 }
 0x322   :  { %1146 = vmatpush1.msra.mxu0 %v3237_v38  ;;  %1217 = vmatpush1.msra.mxu1 %v3243_v23 }
 0x323   :  { %1147 = vmatprep.subr.mxu0 %v3249_v50  ;;  %1218 = vmatprep.subr.mxu1 %v3255_v5 }
 0x324   :  { %1148 = vmatpush1.msra.mxu0 %v3261_v56  ;;  %1219 = vmatpush1.msra.mxu1 %v3267_v41 }
 0x325   :  { %1149 = vmatprep.subr.mxu0 %v3273_v62  ;;  %1220 = vmatprep.subr.mxu1 %v3279_v61 }
 0x326   :  { %1150 = vmatpush1.msra.mxu0 %v3285_v55  ;;  %1221 = vmatpush1.msra.mxu1 %v3291_v59 }
 0x327   :  { %1151 = vmatprep.subr.mxu0 %v3297_v60  ;;  %1222 = vmatprep.subr.mxu1 %v3303_v3 }
 0x328   :  { %1152 = vmatpush1.msra.mxu0 %v3309_v58  ;;  %1223 = vmatpush1.msra.mxu1 %v3315_v0 }
 0x329   :  { %1153 = vmatprep.subr.mxu0 %v3321_v63  ;;  %1224 = vmatprep.subr.mxu1 %v3327_v7 }
 0x32a   :  { %1154 = vmatpush1.msra.mxu0 %v3333_v6  ;;  %1225 = vmatpush1.msra.mxu1 %v3339_v14 }
 0x32b   :  { %1155 = vmatprep.subr.mxu0 %v3345_v4  ;;  %1226 = vmatprep.subr.mxu1 %v3351_v31  ;;  %v3369_v4 = vld [vmem:[%s3834_s2 + $0x108] sm:$0xff]  ;;  %v3375_v31 = vld [vmem:[%s3834_s2 + $0x118] sm:$0xff] }
 0x32c   :  { %1156 = vmatpush1.msra.mxu0 %v3357_v33  ;;  %1227 = vmatpush1.msra.mxu1 %v3363_v34 }
 0x32d   :  { %1157 = vmatprep.subr.mxu0 %v3369_v4  ;;  %1228 = vmatprep.subr.mxu1 %v3375_v31 }
 0x32e   :  { %1158 = vmatpush1.msra.mxu0 %v2655_v39  ;;  %1229 = vmatpush1.msra.mxu1 %v2660_v40  ;;  %v4031_v40 = vld [vmem:[#allocation39_spill] sm:$0xff] }
 0x32f   :  { %1159 = vmatprep.subr.mxu0 %v2672_v42  ;;  %1230 = vmatprep.subr.mxu1 %v2677_v43 }
 0x330   :  { %1160 = vmatpush1.msra.mxu0 %v2684_v44  ;;  %1231 = vmatpush1.msra.mxu1 %v2689_v45  ;;  %v4032_v45 = vld [vmem:[#allocation41_spill] sm:$0xff] }
 0x331   :  { %1161 = vmatprep.subr.mxu0 %v2696_v46  ;;  %1232 = vmatprep.subr.mxu1 %v2701_v47 }
 0x332   :  { %1162 = vmatpush1.msra.mxu0 %v2710_v48  ;;  %1233 = vmatpush1.msra.mxu1 %v2715_v49 }
 0x333   :  { %1163 = vmatprep.subr.mxu0 %v2727_v51  ;;  %1234 = vmatprep.subr.mxu1 %v2732_v52  ;;  %v4033_v51 = vld [vmem:[#allocation42_spill] sm:$0xff] }
 0x334   :  { %1164 = vmatpush1.msra.mxu0 %v2739_v53  ;;  %1235 = vmatpush1.msra.mxu1 %v2744_v54  ;;  %v4034_v53 = vld [vmem:[#allocation40_spill] sm:$0xff] }
 0x335   :  { %1165 = vmatprep.subr.mxu0 %v3978_v57  ;;  %1236 = vmatprep.subr.mxu1 %v3979_v1 }
 0x336   :  { %1166 = vmatpush1.msra.mxu0 %v3980_v32  ;;  %1237 = vmatpush1.msra.mxu1 %v4005_v8 }
 0x337   :  { %1167 = vmatprep.subr.mxu0 %v4006_v9  ;;  %1238 = vmatprep.subr.mxu1 %v4007_v10 }
 0x338   :  { %1168 = vmatpush1.msra.mxu0 %v4008_v11  ;;  %1239 = vmatpush1.msra.mxu1 %v4009_v12 }
 0x339   :  { %1169 = vmatprep.subr.mxu0 %v4010_v13  ;;  %1240 = vmatprep.subr.mxu1 %v4011_v15 }
 0x33a   :  { %1170 = vmatpush1.msra.mxu0 %v4012_v16  ;;  %1241 = vmatpush1.msra.mxu1 %v4013_v17 }
 0x33b   :  { %1171 = vmatprep.subr.mxu0 %v4014_v18  ;;  %1242 = vmatprep.subr.mxu1 %v4015_v19 }
 0x33c   :  { %1172 = vmatpush1.msra.mxu0 %v4016_v20  ;;  %1243 = vmatpush1.msra.mxu1 %v4017_v21 }
 0x33d   :  { %1173 = vmatprep.subr.mxu0 %v4018_v22  ;;  %1244 = vmatprep.subr.mxu1 %v4019_v24  ;;  %v4035_v22 = vld [vmem:[#allocation13_spill] sm:$0xff] }
 0x33e   :  { %1174 = vmatpush1.msra.mxu0 %v4020_v25  ;;  %1207 = vmatprep.mubr.f32.mxu0 %v4021_v26  ;;  %v4036_v24 = vld [vmem:[#allocation9_spill] sm:$0xff] }
 0x33f   :  { %1245 = vmatpush1.msra.mxu1 %v4022_v27  ;;  %1278 = vmatprep.mubr.f32.mxu1 %v4021_v26  ;;  %v3455_v25 = vld [vmem:[%s3834_s2 + $0x100] sm:$0xff]  ;;  %v3461_v27 = vld [vmem:[%s3834_s2 + $0x110] sm:$0xff] }
 0x340   :  { %1326 = vmatprep.subr.mxu0 %v3193_v28  ;;  %1397 = vmatprep.subr.mxu1 %v3199_v29 }
 0x3df   :  { %v1026_v39 = vpop.f32.mrf.mxu0  ;;  %v1097_v47 = vpop.f32.mrf.mxu1 }
 0x3e0   :  { %v1102_v42 = vadd.f32 %v1026_v39, %v4031_v40  ;;  %v1104_v54 = vadd.f32 %v1097_v47, %v4034_v53  ;;  %v3473_v39 = vld [vmem:[%s3834_s2 + $0xf8] sm:$0xff]  ;;  %v3479_v40 = vld [vmem:[%s3834_s2 + $0xe0] sm:$0xff]  ;;  %v3515_v47 = vld [vmem:[%s3834_s2 + $0xa8] sm:$0xff] }
 0x3e1   :  { %v1028_v43 = vpop.f32.mrf.mxu0  ;;  %v1099_v49 = vpop.f32.mrf.mxu1  ;;  %v3545_v53 = vld [vmem:[%s3834_s2 + $0x98] sm:$0xff] }
 0x3e2   :  { %v2147_v44 = vmul.f32 -1.442695, %v1102_v42  ;;  %v1103_v46 = vadd.f32 %v1028_v43, %v4032_v45  ;;  %v1105_v52 = vadd.f32 %v1099_v49, %v4033_v51  ;;  %v3485_v42 = vld [vmem:[%s3834_s2 + $0xf0] sm:$0xff]  ;;  %v3491_v43 = vld [vmem:[%s3834_s2 + $0xc8] sm:$0xff]  ;;  %v3503_v45 = vld [vmem:[%s3834_s2 + $0xc0] sm:$0xff] }
 0x3e3   :  { %v3527_v49 = vld [vmem:[%s3834_s2 + $0xa0] sm:$0xff]  ;;  %v3533_v51 = vld [vmem:[%s3834_s2 + $0xb0] sm:$0xff] }
 0x3e4   :  { %2234 = vpow2.f32 %v2147_v44  ;;  %v2148_v48 = vmul.f32 -1.442695, %v1103_v46  ;;  %v2149_v57 = vmul.f32 -1.442695, %v1105_v52  ;;  %v3497_v44 = vld [vmem:[%s3834_s2 + $0xd8] sm:$0xff]  ;;  %v3509_v46 = vld [vmem:[%s3834_s2 + $0xd0] sm:$0xff] }
 0x3e5   :  { %v3539_v52 = vld [vmem:[%s3834_s2 + $0x88] sm:$0xff] }
 0x3e6   :  { %2236 = vpow2.f32 %v2148_v48  ;;  %v3521_v48 = vld [vmem:[%s3834_s2 + $0xb8] sm:$0xff] }
 0x3e7   :  { %2238 = vtanh.f32 %v1104_v54  ;;  %v3551_v54 = vld [vmem:[%s3834_s2 + $0x80] sm:$0xff] }
 0x3e8   :  { %2240 = vpow2.f32 %v2149_v57  ;;  %v3557_v57 = vld [vmem:[%s3834_s2 + $0x90] sm:$0xff] }
 0x3e9   :  { %4037 = vst [vmem:[#allocation10_spill] sm:$0xff] %v3557_v57 }
 0x3f1   :  { %v2235_v1 = vpop.eup %2234 }
 0x3f2   :  { %v1109_v32 = vadd.f32 1.0, %v2235_v1  ;;  %v3563_v1 = vld [vmem:[%s3834_s2 + $0x68] sm:$0xff] }
 0x3f3   :  { %v2237_v8 = vpop.eup %2236  ;;  %4038 = vst [vmem:[#allocation31_spill] sm:$0xff] %v3563_v1 }
 0x3f4   :  { %2242 = vrcp.f32 %v1109_v32  ;;  %v1115_v9 = vadd.f32 1.0, %v2237_v8  ;;  %v2239_v10 = vpop.eup %2238  ;;  %v3569_v32 = vld [vmem:[%s3834_s2 + $0x78] sm:$0xff]  ;;  %v3575_v8 = vld [vmem:[%s3834_s2 + $0x60] sm:$0xff] }
 0x3f5   :  { %v2241_v11 = vpop.eup %2240  ;;  %4039 = vst [vmem:[#allocation33_spill] sm:$0xff] %v3569_v32  ;;  %4040 = vst [vmem:[#allocation34_spill] sm:$0xff] %v3575_v8 }
 0x3f6   :  { %2244 = vrcp.f32 %v1115_v9  ;;  %v1122_v16 = vadd.f32 1.0, %v2241_v11  ;;  %v3581_v9 = vld [vmem:[%s3834_s2 + $0x70] sm:$0xff]  ;;  %v3593_v11 = vld [vmem:[%s3834_s2 + $0x58] sm:$0xff] }
 0x3f7   :  { %4041 = vst [vmem:[#allocation32_spill] sm:$0xff] %v3581_v9  ;;  %4043 = vst [vmem:[#allocation15_spill] sm:$0xff] %v3593_v11 }
 0x3f8   :  { %2246 = vrcp.f32 %v1122_v16  ;;  %v3617_v16 = vld [vmem:[%s3834_s2 + $0x38] sm:$0xff] }
 0x3f9   :  { %4047 = vst [vmem:[#allocation19_spill] sm:$0xff] %v3617_v16 }
 0x401   :  { %v2243_v12 = vpop.eup %2242 }
 0x402   :  { %v1127_v13 = vmul.f32 %v2243_v12, %v2239_v10  ;;  %v3587_v10 = vld [vmem:[%s3834_s2 + $0x48] sm:$0xff]  ;;  %v3599_v12 = vld [vmem:[%s3834_s2 + $0x40] sm:$0xff] }
 0x403   :  { %v2245_v15 = vpop.eup %2244  ;;  %4042 = vst [vmem:[#allocation14_spill] sm:$0xff] %v3587_v10  ;;  %4044 = vst [vmem:[#allocation16_spill] sm:$0xff] %v3599_v12 }
 0x404   :  { %v1126_v17 = vmul.f32 %v2245_v15, %v3207_v30  ;;  %v3467_v30 = vld [vmem:[%s3834_s2 + $0xe8] sm:$0xff] }
 0x405   :  { %v2247_v19 = vpop.eup %2246  ;;  %v3611_v15 = vld [vmem:[%s3834_s2 + $0x28] sm:$0xff] }
 0x406   :  { %v3421_v18 = vadd.f32 %v1127_v13, %v1126_v17  ;;  %v3605_v13 = vld [vmem:[%s3834_s2 + $0x50] sm:$0xff]  ;;  %4046 = vst [vmem:[#allocation18_spill] sm:$0xff] %v3611_v15  ;;  %v3623_v17 = vld [vmem:[%s3834_s2 + $0x20] sm:$0xff] }
 0x407   :  { %4045 = vst [vmem:[#allocation17_spill] sm:$0xff] %v3605_v13  ;;  %4048 = vst [vmem:[#allocation20_spill] sm:$0xff] %v3623_v17 }
 0x408   :  { %2248 = vtanh.f32 %v3421_v18 }
 0x415   :  { %v2249_v20 = vpop.eup %2248 }
 0x416   :  { %v1130_v21 = vmul.f32 %v2249_v20, %v2247_v19  ;;  %v3629_v19 = vld [vmem:[%s3834_s2 + $0x30] sm:$0xff]  ;;  %v3635_v20 = vld [vmem:[%s3834_s2 + $0x8] sm:$0xff] }
 0x417   :  { %4049 = vst [vmem:[#allocation21_spill] sm:$0xff] %v3629_v19  ;;  %4050 = vst [vmem:[#allocation22_spill] sm:$0xff] %v3635_v20 }
 0x418   :  { %1134 = vst [vmem:[#allocation5 + $0x18] sm:$0xff] %v1130_v21  ;;  %1208 = vmatmul.mubr.f32.vlgmr.msra.gmra.mxu0 %v1130_v21  ;;  %1279 = vmatmul.mubr.f32.vlgmr.msra.gmra.mxu1 %v1130_v21  ;;  %v3641_v21 = vld [vmem:[%s3834_s2 + $0x18] sm:$0xff] }
 0x419   :  { %1327 = vmatpush1.msra.mxu0 %v3213_v35  ;;  %1398 = vmatpush1.msra.mxu1 %v3219_v2  ;;  %4051 = vst [vmem:[#allocation23_spill] sm:$0xff] %v3641_v21 }
 0x41a   :  { %1328 = vmatprep.subr.mxu0 %v3225_v36  ;;  %1399 = vmatprep.subr.mxu1 %v3231_v37 }
 0x41b   :  { %1329 = vmatpush1.msra.mxu0 %v3237_v38  ;;  %1400 = vmatpush1.msra.mxu1 %v3243_v23 }
 0x41c   :  { %1330 = vmatprep.subr.mxu0 %v3249_v50  ;;  %1401 = vmatprep.subr.mxu1 %v3255_v5 }
 0x41d   :  { %1331 = vmatpush1.msra.mxu0 %v3261_v56  ;;  %1402 = vmatpush1.msra.mxu1 %v3267_v41 }
 0x41e   :  { %1332 = vmatprep.subr.mxu0 %v3273_v62  ;;  %1403 = vmatprep.subr.mxu1 %v3279_v61 }
 0x41f   :  { %1333 = vmatpush1.msra.mxu0 %v3285_v55  ;;  %1404 = vmatpush1.msra.mxu1 %v3291_v59 }
 0x420   :  { %1334 = vmatprep.subr.mxu0 %v3297_v60  ;;  %1405 = vmatprep.subr.mxu1 %v3303_v3 }
 0x421   :  { %1335 = vmatpush1.msra.mxu0 %v3309_v58  ;;  %1406 = vmatpush1.msra.mxu1 %v3315_v0 }
 0x422   :  { %1336 = vmatprep.subr.mxu0 %v3321_v63  ;;  %1407 = vmatprep.subr.mxu1 %v3327_v7 }
 0x423   :  { %1337 = vmatpush1.msra.mxu0 %v3333_v6  ;;  %1408 = vmatpush1.msra.mxu1 %v3339_v14 }
 0x424   :  { %1338 = vmatprep.subr.mxu0 %v4035_v22  ;;  %1409 = vmatprep.subr.mxu1 %v4036_v24 }
 0x425   :  { %1339 = vmatpush1.msra.mxu0 %v3357_v33  ;;  %1410 = vmatpush1.msra.mxu1 %v3363_v34 }
 0x426   :  { %1340 = vmatprep.subr.mxu0 %v3369_v4  ;;  %1411 = vmatprep.subr.mxu1 %v3375_v31 }
 0x427   :  { %1341 = vmatpush1.msra.mxu0 %v3455_v25  ;;  %1412 = vmatpush1.msra.mxu1 %v3461_v27 }
 0x428   :  { %1342 = vmatprep.subr.mxu0 %v3467_v30  ;;  %1413 = vmatprep.subr.mxu1 %v3473_v39 }
 0x429   :  { %1343 = vmatpush1.msra.mxu0 %v3479_v40  ;;  %1414 = vmatpush1.msra.mxu1 %v3485_v42 }
 0x42a   :  { %1344 = vmatprep.subr.mxu0 %v3491_v43  ;;  %1415 = vmatprep.subr.mxu1 %v3497_v44 }
 0x42b   :  { %1345 = vmatpush1.msra.mxu0 %v3503_v45  ;;  %1416 = vmatpush1.msra.mxu1 %v3509_v46 }
 0x42c   :  { %1346 = vmatprep.subr.mxu0 %v3515_v47  ;;  %1417 = vmatprep.subr.mxu1 %v3521_v48 }
 0x42d   :  { %1347 = vmatpush1.msra.mxu0 %v3527_v49  ;;  %1418 = vmatpush1.msra.mxu1 %v3533_v51 }
 0x42e   :  { %1348 = vmatprep.subr.mxu0 %v3539_v52  ;;  %1419 = vmatprep.subr.mxu1 %v3545_v53 }
 0x42f   :  { %1349 = vmatpush1.msra.mxu0 %v3551_v54  ;;  %1420 = vmatpush1.msra.mxu1 %v3557_v57 }
 0x430   :  { %1350 = vmatprep.subr.mxu0 %v3563_v1  ;;  %1421 = vmatprep.subr.mxu1 %v3569_v32  ;;  %v4057_v32 = vld [vmem:[#allocation44_spill] sm:$0xff] }
 0x431   :  { %1351 = vmatpush1.msra.mxu0 %v3575_v8  ;;  %1422 = vmatpush1.msra.mxu1 %v3581_v9  ;;  %v4056_v8 = vld [vmem:[#allocation46_spill] sm:$0xff] }
 0x432   :  { %1352 = vmatprep.subr.mxu0 %v3587_v10  ;;  %1423 = vmatprep.subr.mxu1 %v3593_v11 }
 0x433   :  { %1353 = vmatpush1.msra.mxu0 %v3599_v12  ;;  %1424 = vmatpush1.msra.mxu1 %v3605_v13  ;;  %v4055_v13 = vld [vmem:[#allocation45_spill] sm:$0xff] }
 0x434   :  { %1354 = vmatprep.subr.mxu0 %v3611_v15  ;;  %1425 = vmatprep.subr.mxu1 %v3617_v16 }
 0x435   :  { %1355 = vmatpush1.msra.mxu0 %v3623_v17  ;;  %1426 = vmatpush1.msra.mxu1 %v3629_v19  ;;  %v3647_v17 = vld [vmem:[%s3834_s2] sm:$0xff]  ;;  %v4054_v19 = vld [vmem:[#allocation43_spill] sm:$0xff] }
 0x436   :  { %1356 = vmatprep.subr.mxu0 %v3635_v20  ;;  %1427 = vmatprep.subr.mxu1 %v3641_v21  ;;  %4052 = vst [vmem:[#allocation24_spill] sm:$0xff] %v3647_v17  ;;  %v3654_v20 = vld [vmem:[%s3834_s2 + $0x10] sm:$0xff] }
 0x437   :  { %1357 = vmatpush1.msra.mxu0 %v3647_v17  ;;  %1390 = vmatprep.mubr.f32.mxu0 %v4021_v26  ;;  %4053 = vst [vmem:[#allocation25_spill] sm:$0xff] %v3654_v20 }
 0x438   :  { %1428 = vmatpush1.msra.mxu1 %v3654_v20  ;;  %1461 = vmatprep.mubr.f32.mxu1 %v4021_v26 }
 0x439   :  { %1509 = vmatprep.subr.mxu0 %v3193_v28  ;;  %1580 = vmatprep.subr.mxu1 %v3199_v29 }
 0x4d8   :  { %v1209_v21 = vpop.f32.mrf.mxu0  ;;  %v1280_v11 = vpop.f32.mrf.mxu1 }
 0x4d9   :  { %v1285_v16 = vadd.f32 %v1209_v21, %v4054_v19  ;;  %v1287_v26 = vadd.f32 %v1280_v11, %v4057_v32  ;;  %v4063_v11 = vld [vmem:[#allocation14_spill] sm:$0xff] }
 0x4da   :  { %v1211_v15 = vpop.f32.mrf.mxu0  ;;  %v1282_v9 = vpop.f32.mrf.mxu1 }
 0x4db   :  { %v2150_v17 = vmul.f32 -1.442695, %v1285_v16  ;;  %v1286_v12 = vadd.f32 %v1211_v15, %v4055_v13  ;;  %v1288_v20 = vadd.f32 %v1282_v9, %v4056_v8  ;;  %v4062_v9 = vld [vmem:[#allocation32_spill] sm:$0xff] }
 0x4dd   :  { %2250 = vpow2.f32 %v2150_v17  ;;  %v2151_v10 = vmul.f32 -1.442695, %v1286_v12  ;;  %v2152_v1 = vmul.f32 -1.442695, %v1288_v20  ;;  %v4064_v20 = vld [vmem:[#allocation15_spill] sm:$0xff] }
 0x4df   :  { %2252 = vpow2.f32 %v2151_v10 }
 0x4e0   :  { %2254 = vtanh.f32 %v1287_v26 }
 0x4e1   :  { %2256 = vpow2.f32 %v2152_v1  ;;  %v4061_v1 = vld [vmem:[#allocation34_spill] sm:$0xff] }
 0x4ea   :  { %v2251_v28 = vpop.eup %2250 }
 0x4eb   :  { %v1292_v57 = vadd.f32 1.0, %v2251_v28 }
 0x4ec   :  { %v2253_v29 = vpop.eup %2252 }
 0x4ed   :  { %2258 = vrcp.f32 %v1292_v57  ;;  %v1298_v19 = vadd.f32 1.0, %v2253_v29  ;;  %v2255_v16 = vpop.eup %2254  ;;  %v4058_v29 = vld [vmem:[#allocation10_spill] sm:$0xff]  ;;  %v4060_v57 = vld [vmem:[#allocation33_spill] sm:$0xff] }
 0x4ee   :  { %v2257_v13 = vpop.eup %2256 }
 0x4ef   :  { %2260 = vrcp.f32 %v1298_v19  ;;  %v1305_v10 = vadd.f32 1.0, %v2257_v13  ;;  %v4065_v19 = vld [vmem:[#allocation16_spill] sm:$0xff]  ;;  %v4067_v13 = vld [vmem:[#allocation18_spill] sm:$0xff] }
 0x4f1   :  { %2262 = vrcp.f32 %v1305_v10  ;;  %v4071_v10 = vld [vmem:[#allocation22_spill] sm:$0xff] }
 0x4fa   :  { %v2259_v15 = vpop.eup %2258 }
 0x4fb   :  { %v1310_v17 = vmul.f32 %v2259_v15, %v2255_v16  ;;  %v4066_v16 = vld [vmem:[#allocation17_spill] sm:$0xff]  ;;  %v4068_v15 = vld [vmem:[#allocation19_spill] sm:$0xff] }
 0x4fc   :  { %v2261_v12 = vpop.eup %2260 }
 0x4fd   :  { %v1309_v21 = vmul.f32 %v2261_v12, %v3421_v18  ;;  %v4059_v18 = vld [vmem:[#allocation31_spill] sm:$0xff]  ;;  %v4070_v12 = vld [vmem:[#allocation21_spill] sm:$0xff] }
 0x4fe   :  { %v2263_v28 = vpop.eup %2262 }
 0x4ff   :  { %v3665_v8 = vadd.f32 %v1310_v17, %v1309_v21  ;;  %v4069_v17 = vld [vmem:[#allocation20_spill] sm:$0xff]  ;;  %v4072_v21 = vld [vmem:[#allocation23_spill] sm:$0xff] }
 0x501   :  { %2264 = vtanh.f32 %v3665_v8 }
 0x50e   :  { %v2265_v26 = vpop.eup %2264 }
 0x50f   :  { %v1313_v32 = vmul.f32 %v2265_v26, %v2263_v28  ;;  %v4073_v28 = vld [vmem:[#allocation24_spill] sm:$0xff]  ;;  %v4074_v26 = vmov 0.0  }
 0x511   :  { %1317 = vst [vmem:[#allocation5 + $0x20] sm:$0xff] %v1313_v32  ;;  %1391 = vmatmul.mubr.f32.vlgmr.msra.gmra.mxu0 %v1313_v32  ;;  %1462 = vmatmul.mubr.f32.vlgmr.msra.gmra.mxu1 %v1313_v32  ;;  %v4075_v32 = vld [vmem:[#allocation25_spill] sm:$0xff] }
 0x512   :  { %1510 = vmatpush1.msra.mxu0 %v3213_v35  ;;  %1581 = vmatpush1.msra.mxu1 %v3219_v2 }
 0x513   :  { %1511 = vmatprep.subr.mxu0 %v3225_v36  ;;  %1582 = vmatprep.subr.mxu1 %v3231_v37 }
 0x514   :  { %1512 = vmatpush1.msra.mxu0 %v3237_v38  ;;  %1583 = vmatpush1.msra.mxu1 %v3243_v23 }
 0x515   :  { %1513 = vmatprep.subr.mxu0 %v3249_v50  ;;  %1584 = vmatprep.subr.mxu1 %v3255_v5 }
 0x516   :  { %1514 = vmatpush1.msra.mxu0 %v3261_v56  ;;  %1585 = vmatpush1.msra.mxu1 %v3267_v41 }
 0x517   :  { %1515 = vmatprep.subr.mxu0 %v3273_v62  ;;  %1586 = vmatprep.subr.mxu1 %v3279_v61 }
 0x518   :  { %1516 = vmatpush1.msra.mxu0 %v3285_v55  ;;  %1587 = vmatpush1.msra.mxu1 %v3291_v59 }
 0x519   :  { %1517 = vmatprep.subr.mxu0 %v3297_v60  ;;  %1588 = vmatprep.subr.mxu1 %v3303_v3 }
 0x51a   :  { %1518 = vmatpush1.msra.mxu0 %v3309_v58  ;;  %1589 = vmatpush1.msra.mxu1 %v3315_v0 }
 0x51b   :  { %1519 = vmatprep.subr.mxu0 %v3321_v63  ;;  %1590 = vmatprep.subr.mxu1 %v3327_v7 }
 0x51c   :  { %1520 = vmatpush1.msra.mxu0 %v3333_v6  ;;  %1591 = vmatpush1.msra.mxu1 %v3339_v14 }
 0x51d   :  { %1521 = vmatprep.subr.mxu0 %v4035_v22  ;;  %1592 = vmatprep.subr.mxu1 %v4036_v24 }
 0x51e   :  { %1522 = vmatpush1.msra.mxu0 %v3357_v33  ;;  %1593 = vmatpush1.msra.mxu1 %v3363_v34 }
 0x51f   :  { %1523 = vmatprep.subr.mxu0 %v3369_v4  ;;  %1594 = vmatprep.subr.mxu1 %v3375_v31 }
 0x520   :  { %1524 = vmatpush1.msra.mxu0 %v3455_v25  ;;  %1595 = vmatpush1.msra.mxu1 %v3461_v27 }
 0x521   :  { %1525 = vmatprep.subr.mxu0 %v3467_v30  ;;  %1596 = vmatprep.subr.mxu1 %v3473_v39 }
 0x522   :  { %1526 = vmatpush1.msra.mxu0 %v3479_v40  ;;  %1597 = vmatpush1.msra.mxu1 %v3485_v42 }
 0x523   :  { %1527 = vmatprep.subr.mxu0 %v3491_v43  ;;  %1598 = vmatprep.subr.mxu1 %v3497_v44 }
 0x524   :  { %1528 = vmatpush1.msra.mxu0 %v3503_v45  ;;  %1599 = vmatpush1.msra.mxu1 %v3509_v46 }
 0x525   :  { %1529 = vmatprep.subr.mxu0 %v3515_v47  ;;  %1600 = vmatprep.subr.mxu1 %v3521_v48 }
 0x526   :  { %1530 = vmatpush1.msra.mxu0 %v3527_v49  ;;  %1601 = vmatpush1.msra.mxu1 %v3533_v51 }
 0x527   :  { %1531 = vmatprep.subr.mxu0 %v3539_v52  ;;  %1602 = vmatprep.subr.mxu1 %v3545_v53 }
 0x528   :  { %1532 = vmatpush1.msra.mxu0 %v3551_v54  ;;  %1603 = vmatpush1.msra.mxu1 %v4058_v29 }
 0x529   :  { %1533 = vmatprep.subr.mxu0 %v4059_v18  ;;  %1604 = vmatprep.subr.mxu1 %v4060_v57  ;;  %v4081_v57 = vld [vmem:[#allocation48_spill] sm:$0xff] }
 0x52a   :  { %1534 = vmatpush1.msra.mxu0 %v4061_v1  ;;  %1605 = vmatpush1.msra.mxu1 %v4062_v9  ;;  %v4080_v1 = vld [vmem:[#allocation50_spill] sm:$0xff] }
 0x52b   :  { %1535 = vmatprep.subr.mxu0 %v4063_v11  ;;  %1606 = vmatprep.subr.mxu1 %v4064_v20 }
 0x52c   :  { %1536 = vmatpush1.msra.mxu0 %v4065_v19  ;;  %1607 = vmatpush1.msra.mxu1 %v4066_v16  ;;  %v4076_v16 = vld [vmem:[#allocation11_spill] sm:$0xff] }
 0x52d   :  { %1537 = vmatprep.subr.mxu0 %v4067_v13  ;;  %1608 = vmatprep.subr.mxu1 %v4068_v15  ;;  %v4077_v13 = vld [vmem:[#allocation12_spill] sm:$0xff] }
 0x52e   :  { %1538 = vmatpush1.msra.mxu0 %v4069_v17  ;;  %1609 = vmatpush1.msra.mxu1 %v4070_v12  ;;  %v4078_v17 = vld [vmem:[#allocation47_spill] sm:$0xff] }
 0x52f   :  { %1539 = vmatprep.subr.mxu0 %v4071_v10  ;;  %1610 = vmatprep.subr.mxu1 %v4072_v21  ;;  %v4079_v10 = vld [vmem:[#allocation49_spill] sm:$0xff] }
 0x530   :  { %1540 = vmatpush1.msra.mxu0 %v4073_v28  ;;  %1573 = vmatprep.mubr.f32.mxu0 %v4074_v26 }
 0x531   :  { %1611 = vmatpush1.msra.mxu1 %v4075_v32  ;;  %1644 = vmatprep.mubr.f32.mxu1 %v4074_v26 }
 0x532   :  { %1692 = vmatprep.subr.mxu0 %v4076_v16  ;;  %1763 = vmatprep.subr.mxu1 %v4077_v13 }
 0x5d1   :  { %v1392_v15 = vpop.f32.mrf.mxu0  ;;  %v1463_v21 = vpop.f32.mrf.mxu1 }
 0x5d2   :  { %v1468_v19 = vadd.f32 %v1392_v15, %v4078_v17  ;;  %v1470_v26 = vadd.f32 %v1463_v21, %v4081_v57 }
 0x5d3   :  { %v1394_v12 = vpop.f32.mrf.mxu0  ;;  %v1465_v9 = vpop.f32.mrf.mxu1 }
 0x5d4   :  { %v2153_v20 = vmul.f32 -1.442695, %v1468_v19  ;;  %v1469_v11 = vadd.f32 %v1394_v12, %v4079_v10  ;;  %v1471_v32 = vadd.f32 %v1465_v9, %v4080_v1 }
 0x5d6   :  { %2266 = vpow2.f32 %v2153_v20  ;;  %v2154_v28 = vmul.f32 -1.442695, %v1469_v11  ;;  %v2155_v18 = vmul.f32 -1.442695, %v1471_v32 }
 0x5d8   :  { %2268 = vpow2.f32 %v2154_v28 }
 0x5d9   :  { %2270 = vtanh.f32 %v1470_v26  ;;  %v1867_v26 = vld [vmem:[%s3836_s4] sm:$0xff] }
 0x5da   :  { %2272 = vpow2.f32 %v2155_v18 }
 0x5e3   :  { %v2267_v16 = vpop.eup %2266 }
 0x5e4   :  { %v1475_v29 = vadd.f32 1.0, %v2267_v16  ;;  %v4104_v16 = vld [vmem:[#allocation55_spill] sm:$0xff] }
 0x5e5   :  { %v2269_v13 = vpop.eup %2268 }
 0x5e6   :  { %2274 = vrcp.f32 %v1475_v29  ;;  %v1481_v15 = vadd.f32 1.0, %v2269_v13  ;;  %v2271_v19 = vpop.eup %2270 }
 0x5e7   :  { %v2273_v17 = vpop.eup %2272 }
 0x5e8   :  { %2276 = vrcp.f32 %v1481_v15  ;;  %v1488_v10 = vadd.f32 1.0, %v2273_v17  ;;  %v4105_v17 = vld [vmem:[#allocation57_spill] sm:$0xff] }
 0x5ea   :  { %2278 = vrcp.f32 %v1488_v10 }
 0x5f3   :  { %v2275_v20 = vpop.eup %2274 }
 0x5f4   :  { %v1493_v12 = vmul.f32 %v2275_v20, %v2271_v19 }
 0x5f5   :  { %v2277_v11 = vpop.eup %2276 }
 0x5f6   :  { %v1492_v28 = vmul.f32 %v2277_v11, %v3665_v8 }
 0x5f7   :  { %v2279_v57 = vpop.eup %2278 }
 0x5f8   :  { %v3739_v1 = vadd.f32 %v1493_v12, %v1492_v28  ;;  %v4106_v28 = vld [vmem:[#allocation58_spill] sm:$0xff] }
 0x5fa   :  { %2280 = vtanh.f32 %v3739_v1 }
 0x607   :  { %v2281_v9 = vpop.eup %2280 }
 0x608   :  { %v1496_v21 = vmul.f32 %v2281_v9, %v2279_v57  ;;  %v4107_v57 = vld [vmem:[#allocation56_spill] sm:$0xff] }
 0x60a   :  { %1500 = vst [vmem:[#allocation5 + $0x28] sm:$0xff] %v1496_v21  ;;  %1574 = vmatmul.mubr.f32.vlgmr.msra.gmra.mxu0 %v1496_v21  ;;  %1645 = vmatmul.mubr.f32.vlgmr.msra.gmra.mxu1 %v1496_v21 }
 0x60b   :  { %1693 = vmatpush1.msra.mxu0 %v3213_v35  ;;  %1764 = vmatpush1.msra.mxu1 %v3219_v2  ;;  %v4082_v35 = vld [vmem:[#allocation10_spill] sm:$0xff]  ;;  %v4083_v2 = vld [vmem:[#allocation31_spill] sm:$0xff] }
 0x60c   :  { %1694 = vmatprep.subr.mxu0 %v3225_v36  ;;  %1765 = vmatprep.subr.mxu1 %v3231_v37  ;;  %v4084_v36 = vld [vmem:[#allocation33_spill] sm:$0xff]  ;;  %v4085_v37 = vld [vmem:[#allocation34_spill] sm:$0xff] }
 0x60d   :  { %1695 = vmatpush1.msra.mxu0 %v3237_v38  ;;  %1766 = vmatpush1.msra.mxu1 %v3243_v23  ;;  %v4086_v38 = vld [vmem:[#allocation32_spill] sm:$0xff]  ;;  %v4087_v23 = vld [vmem:[#allocation14_spill] sm:$0xff] }
 0x60e   :  { %1696 = vmatprep.subr.mxu0 %v3249_v50  ;;  %1767 = vmatprep.subr.mxu1 %v3255_v5  ;;  %v4088_v50 = vld [vmem:[#allocation15_spill] sm:$0xff]  ;;  %v4089_v5 = vld [vmem:[#allocation16_spill] sm:$0xff] }
 0x60f   :  { %1697 = vmatpush1.msra.mxu0 %v3261_v56  ;;  %1768 = vmatpush1.msra.mxu1 %v3267_v41  ;;  %v4090_v56 = vld [vmem:[#allocation17_spill] sm:$0xff]  ;;  %v4091_v41 = vld [vmem:[#allocation18_spill] sm:$0xff] }
 0x610   :  { %1698 = vmatprep.subr.mxu0 %v3273_v62  ;;  %1769 = vmatprep.subr.mxu1 %v3279_v61  ;;  %v4092_v62 = vld [vmem:[#allocation19_spill] sm:$0xff]  ;;  %v4093_v61 = vld [vmem:[#allocation20_spill] sm:$0xff] }
 0x611   :  { %1699 = vmatpush1.msra.mxu0 %v3285_v55  ;;  %1770 = vmatpush1.msra.mxu1 %v3291_v59  ;;  %v4094_v55 = vld [vmem:[#allocation21_spill] sm:$0xff]  ;;  %v4095_v59 = vld [vmem:[#allocation22_spill] sm:$0xff] }
 0x612   :  { %1700 = vmatprep.subr.mxu0 %v3297_v60  ;;  %1771 = vmatprep.subr.mxu1 %v3303_v3  ;;  %v4096_v60 = vld [vmem:[#allocation23_spill] sm:$0xff]  ;;  %v4097_v3 = vld [vmem:[#allocation24_spill] sm:$0xff] }
 0x613   :  { %1701 = vmatpush1.msra.mxu0 %v3309_v58  ;;  %1772 = vmatpush1.msra.mxu1 %v3315_v0  ;;  %v4098_v58 = vmov 0.0   ;;  %v4099_v0 = vld [vmem:[#allocation25_spill] sm:$0xff] }
 0x614   :  { %1702 = vmatprep.subr.mxu0 %v3321_v63  ;;  %1773 = vmatprep.subr.mxu1 %v3327_v7  ;;  %v4100_v7 = vld [vmem:[#allocation51_spill] sm:$0xff] }
 0x615   :  { %1703 = vmatpush1.msra.mxu0 %v3333_v6  ;;  %1774 = vmatpush1.msra.mxu1 %v3339_v14 }
 0x616   :  { %1704 = vmatprep.subr.mxu0 %v4035_v22  ;;  %1775 = vmatprep.subr.mxu1 %v4036_v24 }
 0x617   :  { %1705 = vmatpush1.msra.mxu0 %v3357_v33  ;;  %1776 = vmatpush1.msra.mxu1 %v3363_v34 }
 0x618   :  { %1706 = vmatprep.subr.mxu0 %v3369_v4  ;;  %1777 = vmatprep.subr.mxu1 %v3375_v31  ;;  %v4101_v31 = vld [vmem:[#allocation53_spill] sm:$0xff] }
 0x619   :  { %1707 = vmatpush1.msra.mxu0 %v3455_v25  ;;  %1778 = vmatpush1.msra.mxu1 %v3461_v27  ;;  %v4102_v25 = vld [vmem:[#allocation54_spill] sm:$0xff] }
 0x61a   :  { %1708 = vmatprep.subr.mxu0 %v3467_v30  ;;  %1779 = vmatprep.subr.mxu1 %v3473_v39  ;;  %v4103_v30 = vld [vmem:[#allocation52_spill] sm:$0xff] }
 0x61b   :  { %1709 = vmatpush1.msra.mxu0 %v3479_v40  ;;  %1780 = vmatpush1.msra.mxu1 %v3485_v42 }
 0x61c   :  { %1710 = vmatprep.subr.mxu0 %v3491_v43  ;;  %1781 = vmatprep.subr.mxu1 %v3497_v44 }
 0x61d   :  { %1711 = vmatpush1.msra.mxu0 %v3503_v45  ;;  %1782 = vmatpush1.msra.mxu1 %v3509_v46 }
 0x61e   :  { %1712 = vmatprep.subr.mxu0 %v3515_v47  ;;  %1783 = vmatprep.subr.mxu1 %v3521_v48 }
 0x61f   :  { %1713 = vmatpush1.msra.mxu0 %v3527_v49  ;;  %1784 = vmatpush1.msra.mxu1 %v3533_v51 }
 0x620   :  { %1714 = vmatprep.subr.mxu0 %v3539_v52  ;;  %1785 = vmatprep.subr.mxu1 %v3545_v53 }
 0x621   :  { %1715 = vmatpush1.msra.mxu0 %v3551_v54  ;;  %1786 = vmatpush1.msra.mxu1 %v4082_v35 }
 0x622   :  { %1716 = vmatprep.subr.mxu0 %v4083_v2  ;;  %1787 = vmatprep.subr.mxu1 %v4084_v36 }
 0x623   :  { %1717 = vmatpush1.msra.mxu0 %v4085_v37  ;;  %1788 = vmatpush1.msra.mxu1 %v4086_v38 }
 0x624   :  { %1718 = vmatprep.subr.mxu0 %v4087_v23  ;;  %1789 = vmatprep.subr.mxu1 %v4088_v50 }
 0x625   :  { %1719 = vmatpush1.msra.mxu0 %v4089_v5  ;;  %1790 = vmatpush1.msra.mxu1 %v4090_v56 }
 0x626   :  { %1720 = vmatprep.subr.mxu0 %v4091_v41  ;;  %1791 = vmatprep.subr.mxu1 %v4092_v62 }
 0x627   :  { %1721 = vmatpush1.msra.mxu0 %v4093_v61  ;;  %1792 = vmatpush1.msra.mxu1 %v4094_v55  ;;  %v1870_v55 = vld [vmem:[#allocation5 + $0x8] sm:$0x1] }
 0x628   :  { %1722 = vmatprep.subr.mxu0 %v4095_v59  ;;  %1793 = vmatprep.subr.mxu1 %v4096_v60  ;;  %v1991_v60 = vld [vmem:[#allocation5 + $0x9] sm:$0x1] }
 0x629   :  { %1723 = vmatpush1.msra.mxu0 %v4097_v3  ;;  %1756 = vmatprep.mubr.f32.mxu0 %v4098_v58 }
 0x62a   :  { %1794 = vmatpush1.msra.mxu1 %v4099_v0  ;;  %1827 = vmatprep.mubr.f32.mxu1 %v4098_v58  ;;  %v1871_v58 = vld [vmem:[#allocation5 + $0x10] sm:$0x1] }
 0x6ca   :  { %v1575_v63 = vpop.f32.mrf.mxu0  ;;  %v1646_v34 = vpop.f32.mrf.mxu1 }
 0x6cb   :  { %v1651_v6 = vadd.f32 %v1575_v63, %v4100_v7  ;;  %v1653_v39 = vadd.f32 %v1646_v34, %v4103_v30  ;;  %v1885_v63 = vrot.slane %v1870_v55, 7  ;;  %v1992_v7 = vld [vmem:[#allocation5 + $0x11] sm:$0x1]  ;;  %v1888_v34 = vrot.slane %v1871_v58, 6 }
 0x6cc   :  { %v1577_v14 = vpop.f32.mrf.mxu0  ;;  %v1648_v24 = vpop.f32.mrf.mxu1  ;;  %v2008_v30 = vrot.slane %v1992_v7, 6 }
 0x6cd   :  { %v2156_v4 = vmul.f32 -1.442695, %v1651_v6  ;;  %v1652_v33 = vadd.f32 %v1577_v14, %v4101_v31  ;;  %v1654_v27 = vadd.f32 %v1648_v24, %v4102_v25  ;;  %v1869_v6 = vld [vmem:[#allocation5] sm:$0x1]  ;;  %v1872_v14 = vld [vmem:[#allocation5 + $0x18] sm:$0x1] }
 0x6ce   :  { %v2006_v31 = vrot.slane %v1991_v60, 7  ;;  %v1994_v24 = vld [vmem:[#allocation5 + $0x21] sm:$0x1]  ;;  %v1874_v25 = vld [vmem:[#allocation5 + $0x28] sm:$0x1] }
 0x6cf   :  { %2282 = vpow2.f32 %v2156_v4  ;;  %v2157_v22 = vmul.f32 -1.442695, %v1652_v33  ;;  %v2158_v40 = vmul.f32 -1.442695, %v1654_v27  ;;  %v1993_v4 = vld [vmem:[#allocation5 + $0x19] sm:$0x1] }
 0x6d0   :  { %v1873_v33 = vld [vmem:[#allocation5 + $0x20] sm:$0x1]  ;;  %v1995_v27 = vld [vmem:[#allocation5 + $0x29] sm:$0x1] }
 0x6d1   :  { %2284 = vpow2.f32 %v2157_v22  ;;  %v1990_v22 = vld [vmem:[#allocation5 + $0x1] sm:$0x1] }
 0x6d2   :  { %2286 = vtanh.f32 %v1653_v39 }
 0x6d3   :  { %2288 = vpow2.f32 %v2158_v40  ;;  %v1887_v40 = vsel %vm1886_vm1, %v1885_v63, %v1869_v6 }
 0x6dc   :  { %v2283_v42 = vpop.eup %2282 }
 0x6dd   :  { %v1658_v43 = vadd.f32 1.0, %v2283_v42  ;;  %v1891_v42 = vrot.slane %v1872_v14, 5 }
 0x6de   :  { %v2285_v44 = vpop.eup %2284 }
 0x6df   :  { %2290 = vrcp.f32 %v1658_v43  ;;  %v1664_v45 = vadd.f32 1.0, %v2285_v44  ;;  %v2287_v46 = vpop.eup %2286  ;;  %v2010_v44 = vrot.slane %v1993_v4, 5 }
 0x6e0   :  { %v2289_v47 = vpop.eup %2288 }
 0x6e1   :  { %2292 = vrcp.f32 %v1664_v45  ;;  %v1671_v52 = vadd.f32 1.0, %v2289_v47  ;;  %v1894_v45 = vrot.slane %v1873_v33, 4  ;;  %v2012_v47 = vrot.slane %v1994_v24, 4 }
 0x6e3   :  { %2294 = vrcp.f32 %v1671_v52 }
 0x6ec   :  { %v2291_v48 = vpop.eup %2290 }
 0x6ed   :  { %v1676_v49 = vmul.f32 %v2291_v48, %v2287_v46  ;;  %v2007_v46 = vsel %vm1886_vm1, %v2006_v31, %v1990_v22  ;;  %v1890_v48 = vsel %vm1889_vm2, %v1888_v34, %v1887_v40 }
 0x6ee   :  { %v2293_v51 = vpop.eup %2292 }
 0x6ef   :  { %v1675_v53 = vmul.f32 %v2293_v51, %v3739_v1  ;;  %v2014_v51 = vrot.slane %v1995_v27, 3 }
 0x6f0   :  { %v2295_v8 = vpop.eup %2294 }
 0x6f1   :  { %v1677_v54 = vadd.f32 %v1676_v49, %v1675_v53  ;;  %v1897_v49 = vrot.slane %v1874_v25, 3  ;;  %v2009_v53 = vsel %vm1889_vm2, %v2008_v30, %v2007_v46 }
 0x6f3   :  { %2296 = vtanh.f32 %v1677_v54 }
 0x700   :  { %v2297_v29 = vpop.eup %2296 }
 0x701   :  { %v1679_v18 = vmul.f32 %v2297_v29, %v2295_v8  ;;  %v1893_v8 = vsel %vm1892_vm3, %v1891_v42, %v1890_v48  ;;  %v2011_v29 = vsel %vm1892_vm3, %v2010_v44, %v2009_v53 }
 0x703   :  { %1683 = vst [vmem:[#allocation5 + $0x30] sm:$0xff] %v1679_v18  ;;  %1757 = vmatmul.mubr.f32.vlgmr.msra.gmra.mxu0 %v1679_v18  ;;  %1828 = vmatmul.mubr.f32.vlgmr.msra.gmra.mxu1 %v1679_v18 }
 0x704   :  { %2174 = vmatprep.mubr.msk.f32.mxu0 %vm55_vm0, %v1867_v26  ;;  %2179 = vmatprep.mubr.msk.f32.mxu1 %vm55_vm0, %v1867_v26  ;;  %v1896_v26 = vsel %vm1895_vm4, %v1894_v45, %v1893_v8 }
 0x70a   :  { %v1875_v39 = vld [vmem:[#allocation5 + $0x30] sm:$0x1]  ;;  %v1996_v43 = vld [vmem:[#allocation5 + $0x31] sm:$0x1] }
 0x70b   :  { %v1900_v52 = vrot.slane %v1875_v39, 2 }
 0x7c3   :  { %v1758_v32 = vpop.f32.mrf.mxu0  ;;  %v1829_v12 = vpop.f32.mrf.mxu1 }
 0x7c4   :  { %v1834_v13 = vadd.f32 %v1758_v32, %v4104_v16  ;;  %v1836_v9 = vadd.f32 %v1829_v12, %v4107_v57  ;;  %v2013_v16 = vsel %vm1895_vm4, %v2012_v47, %v2011_v29 }
 0x7c5   :  { %v1760_v15 = vpop.f32.mrf.mxu0  ;;  %v1831_v10 = vpop.f32.mrf.mxu1 }
 0x7c6   :  { %v2159_v19 = vmul.f32 -1.442695, %v1834_v13  ;;  %v1835_v20 = vadd.f32 %v1760_v15, %v4105_v17  ;;  %v1837_v1 = vadd.f32 %v1831_v10, %v4106_v28  ;;  %v1899_v13 = vsel %vm1898_vm5, %v1897_v49, %v1896_v26  ;;  %v1868_v28 = vld [vmem:[%s3836_s4 + $0x8] sm:$0xff]  ;;  %s2378_s4 = scalar_lea.vmem %s2105_s7, 512 }
 0x7c7   :  { %p2379_p0 = scmp.ne.s32.totalorder %s2105_s7, %s2378_s4  ;;  %p2384_p2 = scmp.lt.s32.totalorder %s2378_s4, %s2378_s4 }
 0x7c8   :  { %2298 = vpow2.f32 %v2159_v19  ;;  %v2160_v11 = vmul.f32 -1.442695, %v1835_v20  ;;  %v2161_v21 = vmul.f32 -1.442695, %v1837_v1  ;;  %v2015_v19 = vsel %vm1898_vm5, %v2014_v51, %v2013_v16 }
 0x7c9   :  { %v1902_v20 = vsel %vm1901_vm6, %v1900_v52, %v1899_v13  ;;  %p2385_p3 = por %p2384_p2, %p2383_p1 }
 0x7ca   :  { %2300 = vpow2.f32 %v2160_v11 }
 0x7cb   :  { %2302 = vtanh.f32 %v1836_v9  ;;  %p2386_p4 = pnand %p2385_p3, %p2379_p0 }
 0x7cc   :  { %2304 = vpow2.f32 %v2161_v21 }
 0x7d5   :  { %v2299_v35 = vpop.eup %2298 }
 0x7d6   :  { %v1841_v2 = vadd.f32 1.0, %v2299_v35 }
 0x7d7   :  { %v2301_v36 = vpop.eup %2300 }
 0x7d8   :  { %2306 = vrcp.f32 %v1841_v2  ;;  %v1847_v37 = vadd.f32 1.0, %v2301_v36  ;;  %v2303_v38 = vpop.eup %2302 }
 0x7d9   :  { %v2305_v23 = vpop.eup %2304 }
 0x7da   :  { %2308 = vrcp.f32 %v1847_v37  ;;  %v1854_v41 = vadd.f32 1.0, %v2305_v23 }
 0x7dc   :  { %2310 = vrcp.f32 %v1854_v41 }
 0x7e5   :  { %v2307_v50 = vpop.eup %2306 }
 0x7e6   :  { %v1859_v5 = vmul.f32 %v2307_v50, %v2303_v38 }
 0x7e7   :  { %v2309_v56 = vpop.eup %2308 }
 0x7e8   :  { %v1858_v62 = vmul.f32 %v2309_v56, %v1677_v54  ;;  %v2016_v54 = vrot.slane %v1996_v43, 2 }
 0x7e9   :  { %v2311_v59 = vpop.eup %2310 }
 0x7ea   :  { %v1860_v61 = vadd.f32 %v1859_v5, %v1858_v62  ;;  %v2017_v12 = vsel %vm1901_vm6, %v2016_v54, %v2015_v19 }
 0x7ec   :  { %2312 = vtanh.f32 %v1860_v61 }
 0x7f9   :  { %v2313_v3 = vpop.eup %2312 }
 0x7fa   :  { %v1862_v0 = vmul.f32 %v2313_v3, %v2311_v59 }
 0x7fc   :  { %1866 = vst [vmem:[#allocation5 + $0x38] sm:$0xff] %v1862_v0 }
 0x803   :  { %v1876_v18 = vld [vmem:[#allocation5 + $0x38] sm:$0x1]  ;;  %v1997_v32 = vld [vmem:[#allocation5 + $0x39] sm:$0x1] }
 0x804   :  { %v1903_v15 = vrot.slane %v1876_v18, 1  ;;  %v2018_v17 = vrot.slane %v1997_v32, 1 }
 0x806   :  { %v1905_v11 = vsel %vm1904_vm7, %v1903_v15, %v1902_v20  ;;  %v2019_v10 = vsel %vm1904_vm7, %v2018_v17, %v2017_v12 }
 0x807   :  { %2172 = vmatprep.subr.mxu0 %v1905_v11  ;;  %2177 = vmatprep.subr.mxu1 %v2019_v10 }
 0x808   :  { %2173 = vmatpush3.msra.mxu0 %v1905_v11  ;;  %2178 = vmatpush3.msra.mxu1 %v2019_v10 }
 0x809   :  { %2175 = vmatmul.mubr.msk.f32.vlgmr.msra.gmra.mxu0 %vm55_vm0, %v1868_v28  ;;  %2180 = vmatmul.mubr.msk.f32.vlgmr.msra.gmra.mxu1 %vm55_vm0, %v1868_v28 }
 0x8c9   :  { %v2176_v1 = vpop.f32.mrf.mxu0  ;;  %v2181_v57 = vpop.f32.mrf.mxu1 }
 0x8ca   :  { %1989 = vst [vmem:[#allocation6 + $0x8] sm:$0xff] %v2176_v1  ;;  %2098 = vst [vmem:[#allocation6 + $0x18] sm:$0xff] %v2181_v57 }
 0x8cb   :  { %v1979_v9 = vpop.f32.mrf.mxu0  ;;  %v2087_v21 = vpop.f32.mrf.mxu1 }
 0x8cc   :  { %1988 = vst [vmem:[#allocation6] sm:$0xff] %v1979_v9  ;;  %2097 = vst [vmem:[#allocation6 + $0x10] sm:$0xff] %v2087_v21 }
 0x8cd   :  { %2389 = shalt.err (!%p2386_p4)
}
 0x8ce   :  { %s2402_s8 = smov 128   ;;  %s2403_s9 = smov 8  }
 0x8cf   :  { %2110 = dma.vmem_to_hbm [thread:$0]  %s2105_s7, 512, %s3837_s5, [#allocation7], %s2402_s8, %s2402_s8, %s2403_s9  }
 0x8d0   :  { %2398 = dma.done.wait [#allocation7], 512  }
 0x8d1   :  { %2399 = vsyncadd [#allocation7], 4294966784 }
 0x8d2   :  { %2114 = vsyncpa [#allocation7], 1 }

</bundles_post_ra>
